<compile_context>
chip_gen: v7x
topology: tpu7x:2x2x1
jax: 0.10.0
libtpu: 0.0.40
codegen_flags: <defaults>
</compile_context>

<pallas_src>
import numpy as np
import jax
import jax.numpy as jnp
from jax.experimental import pallas as pl
from jax.experimental.pallas import tpu as pltpu


# ----------------------------------------------------------------------------
# Bilinear interpolation matrix matching F.interpolate(align_corners=False)
# ----------------------------------------------------------------------------
def bilinear_matrix(dst, src):
    scale = src / dst
    W = np.zeros((dst, src), dtype=np.float32)
    for i in range(dst):
        s = (i + 0.5) * scale - 0.5
        s = max(s, 0.0)
        i0 = min(int(np.floor(s)), src - 1)
        i1 = min(i0 + 1, src - 1)
        frac = s - i0
        W[i, i0] += 1.0 - frac
        W[i, i1] += frac
    return jnp.asarray(W)


# Conservative cap: fits under the default scoped VMEM on v5e (16 MiB), v6e and
# v7x (32 MiB) without touching vmem_limit_bytes.
# TODO(synk): make the budget generation-aware via pltpu.get_tpu_info() and set
# vmem_limit_bytes when raising it above the default scoped limit.
_VMEM_BUDGET_BYTES = 12 * 1024 * 1024


def _pick_row_tile(ht_p, *, K, Hs, Ws, Wt, budget_bytes=_VMEM_BUDGET_BYTES):
    """Largest th (multiple of 8, divides ht_p) whose per-step VMEM footprint
    (scratch + double-buffered input/output blocks) fits the budget."""
    def step_bytes(th):
        rows = th * K * Wt * 4            # rows_ref scratch (f32)
        col = Hs * K * Wt * 4             # col_ref scratch (f32)
        x_in = 2 * K * Hs * Ws * 2        # bf16 input block, double buffered
        ww_in = 2 * Ws * Wt * 2
        wh_in = 2 * ht_p * Hs * 4
        lbl_in = 2 * th * Wt * 4
        out = 2 * Wt * 4
        return rows + col + x_in + ww_in + wh_in + lbl_in + out

    divisors = [d for d in range(8, ht_p + 1, 8) if ht_p % d == 0]
    for th in sorted(divisors, reverse=True):
        if step_bytes(th) <= budget_bytes:
            return th
    return divisors[0]


# ----------------------------------------------------------------------------
# Pallas kernel
# ----------------------------------------------------------------------------
def _make_focal_kernel(*, K, Hs, Wt, th, ht_valid, needs_row_mask):
    def kernel(x_ref, ww_ref, wh_ref, lbl_ref, out_ref, col_ref, rows_ref):
        # x_ref   : [1, K, Hs, Ws] bf16  selected source planes for this stack
        # ww_ref  : [Ws, Wt]       bf16  width-interp matrix (transposed)
        # wh_ref  : [Ht_p, Hs]     f32   full height-interp matrix (resident)
        # lbl_ref : [th, Wt]       int32 per-pixel target class for this tile
        # out_ref : [1, 1, 1, Wt]  f32   per-(stack, tile) column partial sums
        # col_ref : [Hs, K*Wt]     f32   VMEM scratch (lane-packed width interp)
        # rows_ref: [th, K*Wt]     f32   VMEM scratch (height-interp row tile)
        t = pl.program_id(1)

        @pl.when(t == 0)
        def _init():
            # Width interpolation of each class plane, lane-packed so every
            # later access is lane-aligned (Wt is a multiple of 128).
            for k in range(K):
                col_ref[:, k * Wt:(k + 1) * Wt] = jnp.dot(
                    x_ref[0, k], ww_ref[...],
                    preferred_element_type=jnp.float32)

        # Height interpolation of ALL K planes in ONE matmul per row tile.
        r0 = pl.multiple_of(t * th, 8)
        wh = wh_ref[pl.ds(r0, th), :]                               # [th, Hs]
        rows_ref[...] = jnp.dot(wh, col_ref[...],
                                preferred_element_type=jnp.float32)  # [th, K*Wt]

        lbl = lbl_ref[...]

        # Stable softmax max over classes (lane-aligned slices only).
        m = rows_ref[:, 0:Wt]
        for k in range(1, K):
            m = jnp.maximum(m, rows_ref[:, k * Wt:(k + 1) * Wt])

        # Fused softmax focal-CE; class selection is compare+select (no onehot).
        ssum = jnp.zeros_like(m)
        sel_e = jnp.zeros_like(m)
        sel_logit = jnp.zeros_like(m)
        for k in range(K):
            rk = rows_ref[:, k * Wt:(k + 1) * Wt]
            ek = jnp.exp(rk - m)
            ssum = ssum + ek
            is_k = lbl == k
            sel_e = jnp.where(is_k, ek, sel_e)
            sel_logit = jnp.where(is_k, rk, sel_logit)

        inv = pl.reciprocal(ssum, approx=True)
        pt = sel_e * inv                          # p_t without a second exp
        ce = jnp.log(ssum) + m - sel_logit        # -log p_t
        one_minus = 1.0 - pt
        focal = one_minus * one_minus * ce        # gamma = 2 (alpha unused, as in ref)

        if needs_row_mask:
            # Zero out the Ht-padding rows (only traced when Ht % 8 != 0).
            row = jax.lax.broadcasted_iota(jnp.int32, (th, Wt), 0) + r0
            focal = jnp.where(row < ht_valid, focal, 0.0)

        # Column partial sums only (sublane reduce); the tiny cross-lane /
        # cross-tile reduce + mean happens in the wrapper.
        out_ref[0, 0] = jnp.sum(focal, axis=0, keepdims=True)

    return kernel


def focal_losses_pallas(x_stacked, labels):
    """x_stacked: [S, K, Hs, Ws] selected query planes (main/aux stacked)
       labels   : [Ht, Wt] int32 per-pixel class in [0, K)
       returns  : [S] float32 focal losses, one per prediction stack."""
    S, K, Hs, Ws = x_stacked.shape
    Ht, Wt = labels.shape

    # Pad Ht to a multiple of 8 (zero wh rows + masked focal contributions).
    Ht_p = ((Ht + 7) // 8) * 8
    needs_row_mask = Ht_p != Ht

    wh = bilinear_matrix(Ht, Hs)                                # [Ht, Hs] f32
    ww_t = bilinear_matrix(Wt, Ws).T.astype(jnp.bfloat16)       # [Ws, Wt]
    labels = labels.astype(jnp.int32)
    if needs_row_mask:
        wh = jnp.pad(wh, ((0, Ht_p - Ht), (0, 0)))
        labels = jnp.pad(labels, ((0, Ht_p - Ht), (0, 0)))

    th = _pick_row_tile(Ht_p, K=K, Hs=Hs, Ws=Ws, Wt=Wt)
    nt = Ht_p // th

    x_stacked = x_stacked.astype(jnp.bfloat16)

    kernel = _make_focal_kernel(K=K, Hs=Hs, Wt=Wt, th=th,
                                ht_valid=Ht, needs_row_mask=needs_row_mask)

    flops = S * (2 * K * Hs * Ws * Wt + 2 * Ht_p * Hs * K * Wt
                 + 10 * K * Ht_p * Wt)
    transcendentals = S * (K + 2) * Ht_p * Wt
    bytes_accessed = (S * K * Hs * Ws * 2 + Ws * Wt * 2 + Ht_p * Hs * 4
                      + S * Ht_p * Wt * 4 + S * nt * Wt * 4)

    partials = pl.pallas_call(
        kernel,
        out_shape=jax.ShapeDtypeStruct((S, nt, 1, Wt), jnp.float32),
        grid_spec=pltpu.PrefetchScalarGridSpec(
            num_scalar_prefetch=0,
            grid=(S, nt),
            in_specs=[
                pl.BlockSpec((1, K, Hs, Ws), lambda s, t: (s, 0, 0, 0)),
                pl.BlockSpec((Ws, Wt), lambda s, t: (0, 0)),
                pl.BlockSpec((Ht_p, Hs), lambda s, t: (0, 0)),   # resident wh
                pl.BlockSpec((th, Wt), lambda s, t: (t, 0)),
            ],
            out_specs=pl.BlockSpec((1, 1, 1, Wt), lambda s, t: (s, t, 0, 0)),
            scratch_shapes=[
                pltpu.VMEM((Hs, K * Wt), jnp.float32),   # width-interp planes
                pltpu.VMEM((th, K * Wt), jnp.float32),   # row-tile class planes
            ],
        ),
        compiler_params=pltpu.CompilerParams(
            # S axis is parallel (independent stacks, blocked output): on v7x
            # main/aux shard across the two TensorCores. t stays arbitrary
            # because the width-interp scratch is reused across row tiles.
            dimension_semantics=("parallel", "arbitrary")),
        cost_estimate=pl.CostEstimate(flops=flops,
                                      transcendentals=transcendentals,
                                      bytes_accessed=bytes_accessed),
    )(x_stacked, ww_t, wh, labels)

    return jnp.sum(partials, axis=(1, 2, 3)) * (1.0 / float(Ht * Wt))


# ----------------------------------------------------------------------------
# Glue helpers
# ----------------------------------------------------------------------------
def _labels_from_targets(targets):
    # targets: [1, 1, Ht, Wt] float class-index mask; .long() in the reference
    # truncates, and float labels are exact small ints, so astype matches it.
    return jnp.squeeze(targets).astype(jnp.int32)


def _select_planes(src_masks, gt_index):
    # src_masks: [1, Q, Hs, Ws] -> [K, Hs, Ws] selected query planes.
    return jnp.squeeze(src_masks[:, gt_index], axis=0)


# ----------------------------------------------------------------------------
# Module (JAX port of SetMultiLabelCriterion)
# ----------------------------------------------------------------------------
class SetMultiLabelCriterion:
    def __init__(self, weight_dict, losses, aux_loss=0, aux_loss_norm=0):
        self.num_classes = 1
        self.weight_dict = weight_dict
        self.losses = losses
        self.aux_loss = aux_loss
        self.aux_loss_norm = aux_loss_norm != 0

    @staticmethod
    def loss_masks(src_masks, targets, gt_index):
        # TODO(synk): list-typed gt_index branch (per-instance averaging + dice,
        # the latter discarded by the reference) is not implemented.
        assert not isinstance(gt_index, list)
        labels = _labels_from_targets(targets)
        sel = _select_planes(src_masks, gt_index)
        loss = focal_losses_pallas(sel[None], labels)[0]
        return {'loss_mask': loss}

    def forward(self, outputs, targets, gt_idex):
        assert 'pred_masks' in outputs
        src_masks = outputs['pred_masks']
        if 'aux_pred_masks' in outputs and self.aux_loss > 0:
            aux_masks = outputs['aux_pred_masks']
            if self.aux_loss_norm:
                w_main = 1.0 / (1.0 + self.aux_loss)
                w_aux = self.aux_loss / (1.0 + self.aux_loss)
            else:
                w_main = 1.0
                w_aux = self.aux_loss
            labels = _labels_from_targets(targets)
            if aux_masks.shape == src_masks.shape:
                # Fuse main + aux into one pallas_call (one launch; on v7x the
                # two stacks run on separate TensorCores).
                stacked = jnp.stack([_select_planes(src_masks, gt_idex),
                                     _select_planes(aux_masks, gt_idex)], axis=0)
                losses2 = focal_losses_pallas(stacked, labels)
                return {'loss_mask': w_main * losses2[0] + w_aux * losses2[1]}
            main = focal_losses_pallas(_select_planes(src_masks, gt_idex)[None],
                                       labels)[0]
            aux = focal_losses_pallas(_select_planes(aux_masks, gt_idex)[None],
                                      labels)[0]
            return {'loss_mask': w_main * main + w_aux * aux}
        return self.loss_masks(src_masks, targets, gt_idex)

    __call__ = forward


# ----------------------------------------------------------------------------
# Pure-JAX f32 reference (for correctness check)
# ----------------------------------------------------------------------------
def _focal_ref(src_masks, targets, gt_index):
    target_masks = jnp.squeeze(targets)
    Ht, Wt = target_masks.shape[-2:]
    _, _, Hs, Ws = src_masks.shape
    wh = bilinear_matrix(Ht, Hs)
    ww_t = bilinear_matrix(Wt, Ws).T
    sel = jnp.squeeze(src_masks[:, gt_index], axis=0)           # [K, Hs, Ws]
    K = sel.shape[0]
    resized = jnp.einsum('hs,ksw,wt->kht', wh, sel, ww_t)       # [K, Ht, Wt]
    logits = resized.reshape(K, -1).T                           # [P, K]
    tgt = target_masks.reshape(-1).astype(jnp.int32)
    logp = jax.nn.log_softmax(logits, axis=-1)
    logpt = jnp.take_along_axis(logp, tgt[:, None], axis=-1)[:, 0]
    ce = -logpt
    pt = jnp.exp(logpt)
    return jnp.mean(((1.0 - pt) ** 2) * ce)


if __name__ == "__main__":
    key = jax.random.PRNGKey(0)
    k1, k2, k3 = jax.random.split(key, 3)

    N, Q, Hs, Ws = 1, 8, 8, 128       # source (prediction) resolution
    Ht, Wt = 96, 256                  # target (mask) resolution
    gt_index = jnp.array([0, 2, 4, 6], dtype=jnp.int32)
    K = int(gt_index.shape[0])

    pred_masks = jax.random.normal(k1, (N, Q, Hs, Ws), dtype=jnp.float32)
    aux_pred_masks = jax.random.normal(k2, (N, Q, Hs, Ws), dtype=jnp.float32)
    # target label mask: per-pixel class index in [0, K), stored as float
    targets = jax.random.randint(k3, (1, 1, Ht, Wt), 0, K).astype(jnp.float32)

    crit = SetMultiLabelCriterion(weight_dict={'loss_mask': 1.0},
                                  losses=['masks'], aux_loss=0.5, aux_loss_norm=1)
    out = crit({'pred_masks': pred_masks, 'aux_pred_masks': aux_pred_masks},
               targets, gt_index)
    loss = float(jax.block_until_ready(out['loss_mask']))

    # f32 reference with the same aux weighting (kernel casts inputs to bf16
    # for the width-interp MXU matmul, so compare with a relative tolerance).
    w_main = 1.0 / 1.5
    w_aux = 0.5 / 1.5
    ref = w_main * _focal_ref(pred_masks, targets, gt_index) \
        + w_aux * _focal_ref(aux_pred_masks, targets, gt_index)
    ref = float(jax.block_until_ready(ref))

    assert abs(loss - ref) < 2e-2 * max(1.0, abs(ref)), (loss, ref)
    print("KERNEL_OK")
</pallas_src>

<mosaic_0001>
module attributes {stable_mosaic.version = 11 : i64} {
  func.func @kernel(%arg0: i32, %arg1: i32, %arg2: memref<1x4x8x128xbf16, #tpu.memory_space<vmem>>, %arg3: memref<128x256xbf16, #tpu.memory_space<vmem>>, %arg4: memref<96x8xf32, #tpu.memory_space<vmem>>, %arg5: memref<96x256xi32, #tpu.memory_space<vmem>>, %arg6: memref<1x1x1x256xf32, #tpu.memory_space<vmem>>, %arg7: memref<8x1024xf32, #tpu.memory_space<vmem>>, %arg8: memref<96x1024xf32, #tpu.memory_space<vmem>>) attributes {dimension_semantics = [#tpu.dimension_semantics<parallel>, #tpu.dimension_semantics<arbitrary>], iteration_bounds = array<i64: 2, 1>, scalar_prefetch = 0 : i64, scratch_operands = 2 : i64, tpu.core_type = #tpu.core_type<tc>, window_params = [{transform_indices = @transform_0, window_bounds = array<i64: 1, 4, 8, 128>}, {pipeline_mode = #tpu.pipeline_mode<synchronous>, transform_indices = @transform_1, window_bounds = array<i64: 128, 256>}, {pipeline_mode = #tpu.pipeline_mode<synchronous>, transform_indices = @transform_2, window_bounds = array<i64: 96, 8>}, {transform_indices = @transform_3, window_bounds = array<i64: 96, 256>}, {transform_indices = @transform_4, window_bounds = array<i64: 1, 1, 1, 256>}]} {
    %c0_i32 = arith.constant 0 : i32
    %0 = arith.cmpi eq, %arg1, %c0_i32 : i32
    %1 = arith.extui %0 : i1 to i32
    %c0_i32_0 = arith.constant 0 : i32
    %2 = arith.cmpi ne, %1, %c0_i32_0 : i32
    scf.if %2 {
      %c0_30 = arith.constant 0 : index
      %c0_31 = arith.constant 0 : index
      %c0_32 = arith.constant 0 : index
      %c0_33 = arith.constant 0 : index
      %67 = vector.load %arg2[%c0_30, %c0_31, %c0_32, %c0_33] : memref<1x4x8x128xbf16, #tpu.memory_space<vmem>>, vector<1x1x8x128xbf16>
      %68 = vector.shape_cast %67 : vector<1x1x8x128xbf16> to vector<8x128xbf16>
      %c0_34 = arith.constant 0 : index
      %c0_35 = arith.constant 0 : index
      %69 = vector.load %arg3[%c0_34, %c0_35] : memref<128x256xbf16, #tpu.memory_space<vmem>>, vector<128x256xbf16>
      %cst_36 = arith.constant dense<0.000000e+00> : vector<8x256xf32>
      %70 = tpu.matmul %68, %69, %cst_36 {dimension_numbers = #tpu.dot_dimension_numbers<[1], [0], [0], [1], [0, 0, 1, 1], [], []>} : vector<8x128xbf16>, vector<128x256xbf16>, vector<8x256xf32> -> vector<8x256xf32>
      %c0_37 = arith.constant 0 : index
      %c0_38 = arith.constant 0 : index
      %71 = vector.load %arg7[%c0_37, %c0_38] : memref<8x1024xf32, #tpu.memory_space<vmem>>, vector<8x256xf32>
      tpu.vector_store %arg7[%c0_37, %c0_38], %70 {strides = array<i32>} : memref<8x1024xf32, #tpu.memory_space<vmem>>, vector<8x256xf32>,
      %c0_39 = arith.constant 0 : index
      %c1 = arith.constant 1 : index
      %c0_40 = arith.constant 0 : index
      %c0_41 = arith.constant 0 : index
      %72 = vector.load %arg2[%c0_39, %c1, %c0_40, %c0_41] : memref<1x4x8x128xbf16, #tpu.memory_space<vmem>>, vector<1x1x8x128xbf16>
      %73 = vector.shape_cast %72 : vector<1x1x8x128xbf16> to vector<8x128xbf16>
      %c0_42 = arith.constant 0 : index
      %c0_43 = arith.constant 0 : index
      %74 = vector.load %arg3[%c0_42, %c0_43] : memref<128x256xbf16, #tpu.memory_space<vmem>>, vector<128x256xbf16>
      %cst_44 = arith.constant dense<0.000000e+00> : vector<8x256xf32>
      %75 = tpu.matmul %73, %74, %cst_44 {dimension_numbers = #tpu.dot_dimension_numbers<[1], [0], [0], [1], [0, 0, 1, 1], [], []>} : vector<8x128xbf16>, vector<128x256xbf16>, vector<8x256xf32> -> vector<8x256xf32>
      %c0_45 = arith.constant 0 : index
      %c256_46 = arith.constant 256 : index
      %76 = vector.load %arg7[%c0_45, %c256_46] : memref<8x1024xf32, #tpu.memory_space<vmem>>, vector<8x256xf32>
      tpu.vector_store %arg7[%c0_45, %c256_46], %75 {strides = array<i32>} : memref<8x1024xf32, #tpu.memory_space<vmem>>, vector<8x256xf32>,
      %c0_47 = arith.constant 0 : index
      %c2 = arith.constant 2 : index
      %c0_48 = arith.constant 0 : index
      %c0_49 = arith.constant 0 : index
      %77 = vector.load %arg2[%c0_47, %c2, %c0_48, %c0_49] : memref<1x4x8x128xbf16, #tpu.memory_space<vmem>>, vector<1x1x8x128xbf16>
      %78 = vector.shape_cast %77 : vector<1x1x8x128xbf16> to vector<8x128xbf16>
      %c0_50 = arith.constant 0 : index
      %c0_51 = arith.constant 0 : index
      %79 = vector.load %arg3[%c0_50, %c0_51] : memref<128x256xbf16, #tpu.memory_space<vmem>>, vector<128x256xbf16>
      %cst_52 = arith.constant dense<0.000000e+00> : vector<8x256xf32>
      %80 = tpu.matmul %78, %79, %cst_52 {dimension_numbers = #tpu.dot_dimension_numbers<[1], [0], [0], [1], [0, 0, 1, 1], [], []>} : vector<8x128xbf16>, vector<128x256xbf16>, vector<8x256xf32> -> vector<8x256xf32>
      %c0_53 = arith.constant 0 : index
      %c512_54 = arith.constant 512 : index
      %81 = vector.load %arg7[%c0_53, %c512_54] : memref<8x1024xf32, #tpu.memory_space<vmem>>, vector<8x256xf32>
      tpu.vector_store %arg7[%c0_53, %c512_54], %80 {strides = array<i32>} : memref<8x1024xf32, #tpu.memory_space<vmem>>, vector<8x256xf32>,
      %c0_55 = arith.constant 0 : index
      %c3 = arith.constant 3 : index
      %c0_56 = arith.constant 0 : index
      %c0_57 = arith.constant 0 : index
      %82 = vector.load %arg2[%c0_55, %c3, %c0_56, %c0_57] : memref<1x4x8x128xbf16, #tpu.memory_space<vmem>>, vector<1x1x8x128xbf16>
      %83 = vector.shape_cast %82 : vector<1x1x8x128xbf16> to vector<8x128xbf16>
      %c0_58 = arith.constant 0 : index
      %c0_59 = arith.constant 0 : index
      %84 = vector.load %arg3[%c0_58, %c0_59] : memref<128x256xbf16, #tpu.memory_space<vmem>>, vector<128x256xbf16>
      %cst_60 = arith.constant dense<0.000000e+00> : vector<8x256xf32>
      %85 = tpu.matmul %83, %84, %cst_60 {dimension_numbers = #tpu.dot_dimension_numbers<[1], [0], [0], [1], [0, 0, 1, 1], [], []>} : vector<8x128xbf16>, vector<128x256xbf16>, vector<8x256xf32> -> vector<8x256xf32>
      %c0_61 = arith.constant 0 : index
      %c768_62 = arith.constant 768 : index
      %86 = vector.load %arg7[%c0_61, %c768_62] : memref<8x1024xf32, #tpu.memory_space<vmem>>, vector<8x256xf32>
      tpu.vector_store %arg7[%c0_61, %c768_62], %85 {strides = array<i32>} : memref<8x1024xf32, #tpu.memory_space<vmem>>, vector<8x256xf32>,
    } else {
    }
    %c96_i32 = arith.constant 96 : i32
    %3 = arith.muli %arg1, %c96_i32 : i32
    %4 = tpu.assume_multiple %3, 8 : i32
    %5 = arith.index_cast %4 : i32 to index
    %c0 = arith.constant 0 : index
    %6 = vector.load %arg4[%5, %c0] : memref<96x8xf32, #tpu.memory_space<vmem>>, vector<96x8xf32>
    %c0_1 = arith.constant 0 : index
    %c0_2 = arith.constant 0 : index
    %7 = vector.load %arg7[%c0_1, %c0_2] : memref<8x1024xf32, #tpu.memory_space<vmem>>, vector<8x1024xf32>
    %cst = arith.constant dense<0.000000e+00> : vector<96x1024xf32>
    %8 = tpu.matmul %6, %7, %cst {dimension_numbers = #tpu.dot_dimension_numbers<[1], [0], [0], [1], [0, 0, 1, 1], [], []>} : vector<96x8xf32>, vector<8x1024xf32>, vector<96x1024xf32> -> vector<96x1024xf32>
    %c0_3 = arith.constant 0 : index
    %c0_4 = arith.constant 0 : index
    %9 = vector.load %arg8[%c0_3, %c0_4] : memref<96x1024xf32, #tpu.memory_space<vmem>>, vector<96x1024xf32>
    tpu.vector_store %arg8[%c0_3, %c0_4], %8 {strides = array<i32>} : memref<96x1024xf32, #tpu.memory_space<vmem>>, vector<96x1024xf32>,
    %c0_5 = arith.constant 0 : index
    %c0_6 = arith.constant 0 : index
    %10 = vector.load %arg5[%c0_5, %c0_6] : memref<96x256xi32, #tpu.memory_space<vmem>>, vector<96x256xi32>
    %c0_7 = arith.constant 0 : index
    %c0_8 = arith.constant 0 : index
    %11 = vector.load %arg8[%c0_7, %c0_8] : memref<96x1024xf32, #tpu.memory_space<vmem>>, vector<96x256xf32>
    %c0_9 = arith.constant 0 : index
    %c256 = arith.constant 256 : index
    %12 = vector.load %arg8[%c0_9, %c256] : memref<96x1024xf32, #tpu.memory_space<vmem>>, vector<96x256xf32>
    %13 = arith.maximumf %11, %12 : vector<96x256xf32>
    %c0_10 = arith.constant 0 : index
    %c512 = arith.constant 512 : index
    %14 = vector.load %arg8[%c0_10, %c512] : memref<96x1024xf32, #tpu.memory_space<vmem>>, vector<96x256xf32>
    %15 = arith.maximumf %13, %14 : vector<96x256xf32>
    %c0_11 = arith.constant 0 : index
    %c768 = arith.constant 768 : index
    %16 = vector.load %arg8[%c0_11, %c768] : memref<96x1024xf32, #tpu.memory_space<vmem>>, vector<96x256xf32>
    %17 = arith.maximumf %15, %16 : vector<96x256xf32>
    %cst_12 = arith.constant 0.000000e+00 : f32
    %18 = vector.broadcast %cst_12 : f32 to vector<96x256xf32>
    %cst_13 = arith.constant 0.000000e+00 : f32
    %19 = vector.broadcast %cst_13 : f32 to vector<96x256xf32>
    %cst_14 = arith.constant 0.000000e+00 : f32
    %20 = vector.broadcast %cst_14 : f32 to vector<96x256xf32>
    %c0_15 = arith.constant 0 : index
    %c0_16 = arith.constant 0 : index
    %21 = vector.load %arg8[%c0_15, %c0_16] : memref<96x1024xf32, #tpu.memory_space<vmem>>, vector<96x256xf32>
    %22 = arith.subf %21, %17 : vector<96x256xf32>
    %23 = math.exp %22 : vector<96x256xf32>
    %24 = arith.addf %18, %23 : vector<96x256xf32>
    %c0_i32_17 = arith.constant 0 : i32
    %25 = vector.broadcast %c0_i32_17 : i32 to vector<96x256xi32>
    %26 = arith.cmpi eq, %10, %25 : vector<96x256xi32>
    %27 = arith.select %26, %23, %19 : vector<96x256xi1>, vector<96x256xf32>
    %28 = arith.select %26, %21, %20 : vector<96x256xi1>, vector<96x256xf32>
    %c0_18 = arith.constant 0 : index
    %c256_19 = arith.constant 256 : index
    %29 = vector.load %arg8[%c0_18, %c256_19] : memref<96x1024xf32, #tpu.memory_space<vmem>>, vector<96x256xf32>
    %30 = arith.subf %29, %17 : vector<96x256xf32>
    %31 = math.exp %30 : vector<96x256xf32>
    %32 = arith.addf %24, %31 : vector<96x256xf32>
    %c1_i32 = arith.constant 1 : i32
    %33 = vector.broadcast %c1_i32 : i32 to vector<96x256xi32>
    %34 = arith.cmpi eq, %10, %33 : vector<96x256xi32>
    %35 = arith.select %34, %31, %27 : vector<96x256xi1>, vector<96x256xf32>
    %36 = arith.select %34, %29, %28 : vector<96x256xi1>, vector<96x256xf32>
    %c0_20 = arith.constant 0 : index
    %c512_21 = arith.constant 512 : index
    %37 = vector.load %arg8[%c0_20, %c512_21] : memref<96x1024xf32, #tpu.memory_space<vmem>>, vector<96x256xf32>
    %38 = arith.subf %37, %17 : vector<96x256xf32>
    %39 = math.exp %38 : vector<96x256xf32>
    %40 = arith.addf %32, %39 : vector<96x256xf32>
    %c2_i32 = arith.constant 2 : i32
    %41 = vector.broadcast %c2_i32 : i32 to vector<96x256xi32>
    %42 = arith.cmpi eq, %10, %41 : vector<96x256xi32>
    %43 = arith.select %42, %39, %35 : vector<96x256xi1>, vector<96x256xf32>
    %44 = arith.select %42, %37, %36 : vector<96x256xi1>, vector<96x256xf32>
    %c0_22 = arith.constant 0 : index
    %c768_23 = arith.constant 768 : index
    %45 = vector.load %arg8[%c0_22, %c768_23] : memref<96x1024xf32, #tpu.memory_space<vmem>>, vector<96x256xf32>
    %46 = arith.subf %45, %17 : vector<96x256xf32>
    %47 = math.exp %46 : vector<96x256xf32>
    %48 = arith.addf %40, %47 : vector<96x256xf32>
    %c3_i32 = arith.constant 3 : i32
    %49 = vector.broadcast %c3_i32 : i32 to vector<96x256xi32>
    %50 = arith.cmpi eq, %10, %49 : vector<96x256xi32>
    %51 = arith.select %50, %47, %43 : vector<96x256xi1>, vector<96x256xf32>
    %52 = arith.select %50, %45, %44 : vector<96x256xi1>, vector<96x256xf32>
    %53 = tpu.reciprocal %48 {approx = true} : vector<96x256xf32> -> vector<96x256xf32>
    %54 = arith.mulf %51, %53 : vector<96x256xf32>
    %55 = math.log %48 : vector<96x256xf32>
    %56 = arith.addf %55, %17 : vector<96x256xf32>
    %57 = arith.subf %56, %52 : vector<96x256xf32>
    %cst_24 = arith.constant 1.000000e+00 : f32
    %58 = vector.broadcast %cst_24 : f32 to vector<96x256xf32>
    %59 = arith.subf %58, %54 : vector<96x256xf32>
    %60 = arith.mulf %59, %59 : vector<96x256xf32>
    %61 = arith.mulf %60, %57 : vector<96x256xf32>
    %cst_25 = arith.constant dense<0.000000e+00> : vector<256xf32>
    %62 = vector.multi_reduction <add>, %61, %cst_25 [0] : vector<96x256xf32> to vector<256xf32>
    %63 = vector.shape_cast %62 : vector<256xf32> to vector<1x256xf32>
    %c0_26 = arith.constant 0 : index
    %c0_27 = arith.constant 0 : index
    %c0_28 = arith.constant 0 : index
    %c0_29 = arith.constant 0 : index
    %64 = vector.load %arg6[%c0_26, %c0_27, %c0_28, %c0_29] : memref<1x1x1x256xf32, #tpu.memory_space<vmem>>, vector<1x1x1x256xf32>
    %65 = vector.shape_cast %64 : vector<1x1x1x256xf32> to vector<1x256xf32>
    %66 = vector.shape_cast %63 : vector<1x256xf32> to vector<1x1x1x256xf32>
    tpu.vector_store %arg6[%c0_26, %c0_27, %c0_28, %c0_29], %66 {strides = array<i32>} : memref<1x1x1x256xf32, #tpu.memory_space<vmem>>, vector<1x1x1x256xf32>,
    return
  }
  func.func @transform_0(%arg0: i32, %arg1: i32) -> (i32, i32, i32, i32) {
    %c0_i32 = arith.constant 0 : i32
    %c0_i32_0 = arith.constant 0 : i32
    %c0_i32_1 = arith.constant 0 : i32
    %c0_i32_2 = arith.constant 0 : i32
    return %arg0, %c0_i32, %c0_i32_0, %c0_i32_1 : i32, i32, i32, i32
  }
  func.func @transform_1(%arg0: i32, %arg1: i32) -> (i32, i32) {
    %c0_i32 = arith.constant 0 : i32
    %c0_i32_0 = arith.constant 0 : i32
    %c0_i32_1 = arith.constant 0 : i32
    return %c0_i32, %c0_i32_0 : i32, i32
  }
  func.func @transform_2(%arg0: i32, %arg1: i32) -> (i32, i32) {
    %c0_i32 = arith.constant 0 : i32
    %c0_i32_0 = arith.constant 0 : i32
    %c0_i32_1 = arith.constant 0 : i32
    return %c0_i32, %c0_i32_0 : i32, i32
  }
  func.func @transform_3(%arg0: i32, %arg1: i32) -> (i32, i32) {
    %c0_i32 = arith.constant 0 : i32
    %c0_i32_0 = arith.constant 0 : i32
    return %arg1, %c0_i32 : i32, i32
  }
  func.func @transform_4(%arg0: i32, %arg1: i32) -> (i32, i32, i32, i32) {
    %c0_i32 = arith.constant 0 : i32
    %c0_i32_0 = arith.constant 0 : i32
    %c0_i32_1 = arith.constant 0 : i32
    return %arg0, %arg1, %c0_i32, %c0_i32_0 : i32, i32, i32, i32
  }
}

</mosaic_0001>

<bundles_post_ra>
// kernel: tpu_custom_call.1
= control target key start
LH: loop header
LB: loop body
LE: loop exit
PB: predicated region body
PF: predicated region fallthrough
CT: control target
= control target key end

     0   :  { %9 = vsyncpa [#allocation5], 0  ;;  %s5374_s0 = inlined_call_operand.vmem [shape: bf16[2,4,8,128], index: 0, kind: input, shape index: {}]   ;;  %s5375_s1 = inlined_call_operand.hbm [shape: bf16[128,256], index: 1, kind: input, shape index: {}]   ;;  %s5376_s2 = inlined_call_operand.vmem [shape: f32[96,8], index: 2, kind: input, shape index: {}]   ;;  %s5377_s3 = inlined_call_operand.hbm [shape: s32[96,256], index: 3, kind: input, shape index: {}]   ;;  %s5378_s4 = inlined_call_operand.hbm [shape: f32[2,1,1,256], index: 4, kind: output, shape index: {}]  }
   0x1   :  { %10 = vsyncpa [#allocation8], 0 }
   0x2   :  { %11 = vsyncpa [#allocation6], 0 }
   0x3   :  { %13 = vsyncpa [#allocation6 + $0x1], 0  ;;  %s3491_s15 = smov 0   ;;  %s3493_s16 = smov 0  }
   0x4   :  { %s3495_s17 = smov 0   ;;  %s3497_s18 = smov 0  }
   0x5   :  { %s3499_s19 = smov 0   ;;  %s3501_s20 = smov 0  }
   0x6 LB: > { %s2771_s21 = sadd.s32 4294967295, %s3454_s20   ;;  %s2772_s22 = sadd.s32 4294967294, %s3454_s20   ;;  %s3454_s20 = sphi %s3501_s20, %s19_s20   ;;  %s3450_s19 = sphi %s3499_s19, %s5756_s19   ;;  %s3446_s18 = sphi %s3497_s18, %s5755_s18   ;;  %s3442_s17 = sphi %s3495_s17, %s5754_s17   ;;  %s3438_s16 = sphi %s3493_s16, %s5753_s16   ;;  %s3434_s15 = sphi %s3491_s15, %s5752_s15  }
   0x7   : > { %s31_s23 = sadd.s32 1, %s3450_s19  ;;  %s134_s24 = sadd.s32 1, %s3442_s17 }
   0x8   : > { %p33_p0 = scmp.ge.s32.totalorder %s31_s23, 2  ;;  %p144_p1 = scmp.ne.s32.totalorder %s3442_s17, %s3438_s16 }
   0x9   : > { %p145_p2 = scmp.eq.s32.totalorder %s2771_s21, 1  ;;  %p150_p3 = scmp.ne.s32.totalorder %s3438_s16, %s3434_s15 }
   0xa   : > { %s5758_s23 = smov (%p33_p0, %s31_s23), 0  ;;  %p151_p5 = scmp.eq.s32.totalorder %s2772_s22, 1 }
   0xb   : > { %p3531_p4 = por %p145_p2, %p144_p1  ;;  %s129_s26 = ssub.s32 %s3450_s19, %s5758_s23 }
   0xc   : > { %p2773_p6 = scmp.ge.s32.totalorder %s3454_s20, 1  ;;  %p132_p7 = scmp.eq.s32.totalorder %s129_s26, 0 }
   0xd   : > { %s5527_s25 = scalar_select %p3531_p4, 1, 0 }
   0xe   : > { %p3538_p8 = por %p151_p5, %p150_p3  ;;  %p158_p9 = scmp.lt.s32.totalorder %s3454_s20, 3 }
   0xf   : > { %s3544_s28 = scalar_select %p132_p7, %s3442_s17, %s134_s24  }
  0x10   : > { %s5528_s27 = scalar_select %p3538_p8, 1, 0 }
  0x11   : > { %p3546_p10 = pnand %p2773_p6, %p158_p9  ;;  %p3550_p11 = scmp.eq.s32.totalorder %s2771_s21, 0 }
  0x12   : > { %s3456_s5 = smov [#allocation4]   ;;  %s3457_s8 = smov [#allocation7]  }
  0x13   : > { %s5529_s29 = scalar_select %p3546_p10, 1, 0 }
  0x14   : > { %s5530_s30 = scalar_select %p3550_p11, 1, 0 }
  0x15   : > { %p2915_p12 = pneg %p3546_p10  ;;  %s170_s6 = sshll.u32 %s3456_s5, 4  ;;  %s171_s6 = int_to_ptr.vmem [resolvable:$true] %s170_s6 }
  0x16   : > { %s190_s9 = sshll.u32 %s3457_s8, 4  ;;  %s3312_s12 = scalar_lea.hbm %s5375_s1, 2048  ;;  %s3562_s9 = int_to_ptr.vmem [resolvable:$true] %s190_s9 }
  0x17   : > { %p3558_p13 = pnand %p3550_p11, %p2915_p12  ;;  %p3313_p0 = scmp.ne.s32.totalorder %s5375_s1, %s3312_s12 }
  0x18   : > { %p3319_p5 = scmp.lt.u32.totalorder %s3312_s12, %s5375_s1 }
  0x19   : > { %p3314_p1 = pneg %p3558_p13 }
  0x1b   : > { %p3315_p2 = pnand %p3314_p1, %p3313_p0 }
  0x1d   : > { %p3316_p3 = pneg %p3315_p2 }
  0x1f   : > { %p3321_p6 = pnand %p3319_p5, %p3316_p3 }
  0x21   : > { %3324 = shalt.err (!%p3321_p6)
}
  0x22   : > { %s3325_s24 = scalar_lea.vmem %s171_s6, 2048  ;;  %p3333_p8 = scmp.lt.s32.totalorder %s171_s6, %s171_s6 }
  0x23   : > { %p3326_p7 = scmp.ne.s32.totalorder %s171_s6, %s3325_s24  ;;  %p3334_p4 = scmp.lt.s32.totalorder %s3325_s24, %s3325_s24 }
  0x25   : > { %p3328_p9 = pnand %p3326_p7, %p3314_p1  ;;  %p3335_p11 = por %p3334_p4, %p3333_p8 }
  0x27   : > { %p3329_p12 = pneg %p3328_p9 }
  0x29   : > { %p3336_p10 = pnand %p3335_p11, %p3329_p12 }
  0x2b   : > { %3339 = shalt.err (!%p3336_p10)
}
  0x2c   : > { %s3458_s26 = smov 128   ;;  %s3459_s5 = smov 8  }
  0x2d   : > { %2918 = dma.hbm_to_vmem [thread:$0]  (!%p3558_p13), %s5375_s1, 2048, %s171_s6, [#allocation5], %s3458_s26, %s3458_s26, %s3459_s5  }
  0x2e   : > { %s3340_s13 = scalar_lea.hbm %s5377_s3, 3072 }
  0x2f   : > { %p3341_p0 = scmp.ne.s32.totalorder %s5377_s3, %s3340_s13  ;;  %p3347_p10 = scmp.lt.u32.totalorder %s3340_s13, %s5377_s3 }
  0x31   : > { %p3343_p4 = pnand %p3341_p0, %p3314_p1 }
  0x33   : > { %p3344_p8 = pneg %p3343_p4 }
  0x35   : > { %p3349_p11 = pnand %p3347_p10, %p3344_p8 }
  0x37   : > { %3352 = shalt.err (!%p3349_p11)
}
  0x38   : > { %s3353_s6 = scalar_lea.vmem %s3562_s9, 3072  ;;  %p3361_p6 = scmp.lt.s32.totalorder %s3562_s9, %s3562_s9 }
  0x39   : > { %p3354_p2 = scmp.ne.s32.totalorder %s3562_s9, %s3353_s6  ;;  %p3362_p7 = scmp.lt.s32.totalorder %s3353_s6, %s3353_s6 }
  0x3b   : > { %p3356_p3 = pnand %p3354_p2, %p3314_p1  ;;  %p3363_p9 = por %p3362_p7, %p3361_p6 }
  0x3d   : > { %p3357_p5 = pneg %p3356_p3 }
  0x3f   : > { %p3364_p12 = pnand %p3363_p9, %p3357_p5 }
  0x41   : > { %3367 = shalt.err (!%p3364_p12)
}
  0x42   : > { %s3460_s26 = smov 256   ;;  %s3461_s5 = smov 16  }
  0x43   : > { %2921 = dma.hbm_to_vmem [thread:$0]  (!%p3558_p13), %s5377_s3, 3072, %s3562_s9, [#allocation8], %s3460_s26, %s3460_s26, %s3461_s5  }
  0x44   : > { %p5532_p0 = scmp.ne.s32.totalorder %s5529_s29, 0 }
  0x46   : > { %214 = sbr.rel (%p5532_p0) target bundleno = 874 (0x36a), region = 36 }
  0x4d   : > { %p5533_p1 = scmp.ne.s32.totalorder %s5530_s30, 0 }
  0x4f   : > { %3421 = dma.done.wait (%p5533_p1), [#allocation5], 2048  }
  0x50   : > { %3423 = vsyncadd (%p5533_p1), [#allocation5], 4294965248 }
  0x51   : > { %3425 = dma.done.wait (%p5533_p1), [#allocation8], 3072  }
  0x52   : > { %3427 = vsyncadd (%p5533_p1), [#allocation8], 4294964224  ;;  %v3462_v0 = vmov 0   ;;  %v2988_v1 = vld [vmem:[#allocation4 + $0x4] ss:$8 sps:$4 sm:$0xff]   ;;  %p244_p13 = scmp.lt.s32.totalorder %s3446_s18, 1 }
  0x53   : > { %384 = vmatprep.mubr.bf16.mxu0 %v3462_v0  ;;  %525 = vmatprep.mubr.bf16.mxu1 %v3462_v0  ;;  %v2990_v2 = vld [vmem:[#allocation4] ss:$8 sps:$4 sm:$0xff]   ;;  %v2991_v3 = vld [vmem:[#allocation4 + $0x14] ss:$8 sps:$4 sm:$0xff]   ;;  %v2993_v4 = vld [vmem:[#allocation4 + $0x10] ss:$8 sps:$4 sm:$0xff]  }
  0x54   : > { %352 = vmatprep.subr.bf16.mxu0 %v2988_v1  ;;  %493 = vmatprep.subr.bf16.mxu1 %v2988_v1  ;;  %v2994_v5 = vld [vmem:[#allocation4 + $0x24] ss:$8 sps:$4 sm:$0xff]   ;;  %v2996_v6 = vld [vmem:[#allocation4 + $0x20] ss:$8 sps:$4 sm:$0xff]   ;;  %v2997_v7 = vld [vmem:[#allocation4 + $0x34] ss:$8 sps:$4 sm:$0xff]  }
  0x55   : > { %353 = vmatpush1.bf16.msra.mxu0 %v2990_v2  ;;  %494 = vmatpush1.bf16.msra.mxu1 %v2990_v2  ;;  %v2999_v8 = vld [vmem:[#allocation4 + $0x30] ss:$8 sps:$4 sm:$0xff]   ;;  %v3000_v9 = vld [vmem:[#allocation4 + $0x44] ss:$8 sps:$4 sm:$0xff]   ;;  %v3002_v10 = vld [vmem:[#allocation4 + $0x40] ss:$8 sps:$4 sm:$0xff]  }
  0x56   : > { %354 = vmatprep.subr.bf16.mxu0 %v2991_v3  ;;  %495 = vmatprep.subr.bf16.mxu1 %v2991_v3  ;;  %v3003_v11 = vld [vmem:[#allocation4 + $0x54] ss:$8 sps:$4 sm:$0xff]   ;;  %v3005_v12 = vld [vmem:[#allocation4 + $0x50] ss:$8 sps:$4 sm:$0xff]   ;;  %v3006_v13 = vld [vmem:[#allocation4 + $0x64] ss:$8 sps:$4 sm:$0xff]  }
  0x57   : > { %s245_s29 = scalar_select %p244_p13, %s3446_s18, 1  ;;  %v3008_v14 = vld [vmem:[#allocation4 + $0x60] ss:$8 sps:$4 sm:$0xff]   ;;  %v3009_v15 = vld [vmem:[#allocation4 + $0x74] ss:$8 sps:$4 sm:$0xff]   ;;  %v3463_v21 = vmov 0.0  }
  0x58   : > { %v3011_v16 = vld [vmem:[#allocation4 + $0x70] ss:$8 sps:$4 sm:$0xff]   ;;  %v3641_v26 = vld [vmem:[%s5376_s2] sm:$0xff]  ;;  %vm840_vm0 = vcmask 64512   ;;  %v3651_v31 = vld [vmem:[%s5376_s2 + $0x8] sm:$0xff]  ;;  %s241_s5 = sand.u32 1, %s3438_s16  }
  0x59   : > { %355 = vmatpush1.bf16.msra.mxu0 %v2993_v4  ;;  %496 = vmatpush1.bf16.msra.mxu1 %v2993_v4  ;;  %s2903_s30 = sshll.u32 %s245_s29, 4  ;;  %v3662_v32 = vld [vmem:[%s5376_s2 + $0x10] sm:$0xff]  ;;  %v3673_v33 = vld [vmem:[%s5376_s2 + $0x18] sm:$0xff]  ;;  %v3684_v34 = vld [vmem:[%s5376_s2 + $0x20] sm:$0xff]  ;;  %s2780_s8 = sshll.u32 %s241_s5, 1 }
  0x5a   : > { %356 = vmatprep.subr.bf16.mxu0 %v2994_v5  ;;  %497 = vmatprep.subr.bf16.mxu1 %v2994_v5  ;;  %s3628_s11 = scalar_lea.vmem %s5374_s0, %s2903_s30  ;;  %v3695_v35 = vld [vmem:[%s5376_s2 + $0x28] sm:$0xff]  ;;  %v3706_v36 = vld [vmem:[%s5376_s2 + $0x30] sm:$0xff]  ;;  %v3717_v37 = vld [vmem:[%s5376_s2 + $0x38] sm:$0xff]  ;;  %s2904_s10 = sshll.u32 %s3446_s18, 5 }
  0x5b   : > { %v255_v17 = vld [vmem:[%s3628_s11] sm:$0xf]  ;;  %v2799_v18 = vld [vmem:[%s3628_s11 + $0x4] sm:$0xf]  ;;  %v2816_v19 = vld [vmem:[%s3628_s11 + $0x8] sm:$0xf] }
  0x5c   : > { %v2833_v20 = vld [vmem:[%s3628_s11 + $0xc] sm:$0xf]  ;;  %v828_v42 = vld [vmem:[%s5376_s2 + $0x40] sm:$0xff]  ;;  %v830_v48 = vld [vmem:[%s5376_s2 + $0x50] sm:$0xff]  ;;  %s243_s29 = scalar_lea.vmem [#allocation9], %s2780_s8  ;;  %s5327_s11 = scalar_lea.hbm %s5378_s4, %s2904_s10 }
  0x5d   : > { %357 = vmatpush1.bf16.msra.mxu0 %v2996_v6  ;;  %498 = vmatpush1.bf16.msra.mxu1 %v2996_v6  ;;  %v829_v47 = vld [vmem:[%s5376_s2 + $0x48] sm:$0xff]  ;;  %v831_v49 = vld [vmem:[%s5376_s2 + $0x58] sm:$0xff]  ;;  %v3816_v50 = vld [vmem:[#allocation7] sm:$0xff]  ;;  %s2675_s30 = sshll.u32 %s243_s29, 4  ;;  %s2659_s12 = scalar_lea.sflag [#allocation6], %s241_s5  ;;  %s5329_s30 = int_to_ptr.vmem [resolvable:$true] %s2675_s30 }
  0x5e   : > { %358 = vmatprep.subr.bf16.mxu0 %v2997_v7  ;;  %499 = vmatprep.subr.bf16.mxu1 %v2997_v7  ;;  %v3818_v51 = vld [vmem:[#allocation7 + $0x8] sm:$0xff]  ;;  %vm1809_vm1 = vcmp.eq.s32.totalorder %v3816_v50, 0  ;;  %vm1977_vm3 = vcmp.eq.s32.totalorder %v3816_v50, 1  ;;  %v3823_v52 = vld [vmem:[#allocation7 + $0x10] sm:$0xff]  ;;  %v3830_v55 = vld [vmem:[#allocation7 + $0x18] sm:$0xff]  ;;  %s3368_s13 = scalar_lea.vmem %s5329_s30, 32 }
  0x5f   : > { %vm1810_vm2 = vcmp.eq.s32.totalorder %v3818_v51, 0  ;;  %vm1978_vm4 = vcmp.eq.s32.totalorder %v3818_v51, 1  ;;  %vm1811_vm5 = vcmp.eq.s32.totalorder %v3823_v52, 0  ;;  %vm5496_vm6 = vcmp.eq.s32.totalorder %v3830_v55, 0  ;;  %v4082_v58 = vld [vmem:[#allocation7 + $0x88] sm:$0xff]  ;;  %p3369_p4 = scmp.ne.s32.totalorder %s5329_s30, %s3368_s13  ;;  %p5750_p8 = scmp.ne.s32.totalorder %s5527_s25, 0 }
  0x60   : > { %vm5501_vm7 = vcmp.eq.s32.totalorder %v3823_v52, 1  ;;  %vm5491_vm8 = vcmp.eq.s32.totalorder %v3830_v55, 1  ;;  %5556 = vst [vmem:[#allocation35_spill] sm:$0xff] %v4082_v58  ;;  %s3465_s18 = smov [#allocation9]  }
  0x61   : > { %359 = vmatpush1.bf16.msra.mxu0 %v2999_v8  ;;  %500 = vmatpush1.bf16.msra.mxu1 %v2999_v8  ;;  %p3370_p10 = pnand %p3369_p4, %p5750_p8  ;;  %s3372_s14 = sshll.u32 %s3465_s18, 4  ;;  %s3373_s14 = int_to_ptr.vmem [resolvable:$false] %s3372_s14 }
  0x62   : > { %360 = vmatprep.subr.bf16.mxu0 %v3000_v9  ;;  %501 = vmatprep.subr.bf16.mxu1 %v3000_v9  ;;  %s3374_s21 = scalar_lea.vmem %s3373_s14, 64  ;;  %p3375_p2 = scmp.lt.s32.totalorder %s5329_s30, %s3373_s14 }
  0x63   : > { %p3371_p11 = pneg %p3370_p10  ;;  %p3376_p3 = scmp.lt.s32.totalorder %s3374_s21, %s3368_s13 }
  0x65   : > { %361 = vmatpush1.bf16.msra.mxu0 %v3002_v10  ;;  %502 = vmatpush1.bf16.msra.mxu1 %v3002_v10  ;;  %p3377_p5 = por %p3376_p3, %p3375_p2 }
  0x66   : > { %362 = vmatprep.subr.bf16.mxu0 %v3003_v11  ;;  %503 = vmatprep.subr.bf16.mxu1 %v3003_v11 }
  0x67   : > { %p3378_p6 = pnand %p3377_p5, %p3371_p11 }
  0x69   : > { %363 = vmatpush1.bf16.msra.mxu0 %v3005_v12  ;;  %504 = vmatpush1.bf16.msra.mxu1 %v3005_v12 }
  0x6a   : > { %364 = vmatprep.subr.bf16.mxu0 %v3006_v13  ;;  %505 = vmatprep.subr.bf16.mxu1 %v3006_v13 }
  0x6d   : > { %365 = vmatpush1.bf16.msra.mxu0 %v3008_v14  ;;  %506 = vmatpush1.bf16.msra.mxu1 %v3008_v14 }
  0x6e   : > { %366 = vmatprep.subr.bf16.mxu0 %v3009_v15  ;;  %507 = vmatprep.subr.bf16.mxu1 %v3009_v15 }
  0x71   : > { %367 = vmatpush1.bf16.msra.mxu0 %v3011_v16  ;;  %508 = vmatpush1.bf16.msra.mxu1 %v3011_v16 }
  0x72   : > { %634 = vmatprep.subr.bf16.mxu0 %v2988_v1  ;;  %775 = vmatprep.subr.bf16.mxu1 %v2988_v1 }
  0x74   : > { %385 = vmatmul.mubr.bf16.vlgmr.msra.gmra.mrb[0].mxu0 %v255_v17  ;;  %526 = vmatmul.mubr.bf16.vlgmr.msra.gmra.mrb[0].mxu1 %v2799_v18 }
  0x75   : > { %635 = vmatpush1.bf16.msra.mxu0 %v2990_v2  ;;  %776 = vmatpush1.bf16.msra.mxu1 %v2990_v2 }
  0x76   : > { %636 = vmatprep.subr.bf16.mxu0 %v2991_v3  ;;  %777 = vmatprep.subr.bf16.mxu1 %v2991_v3  ;;  %v3866_v3 = vld [vmem:[#allocation7 + $0x28] sm:$0xff] }
  0x77   : > { %666 = vmatprep.mubr.bf16.mxu0 %v3462_v0  ;;  %807 = vmatprep.mubr.bf16.mxu1 %v3462_v0  ;;  %v3859_v0 = vld [vmem:[#allocation7 + $0x20] sm:$0xff]  ;;  %vm5385_vm10 = vcmp.eq.s32.totalorder %v3866_v3, 0  ;;  %vm5383_vm12 = vcmp.eq.s32.totalorder %v3866_v3, 1 }
  0x78   : > { %vm5488_vm9 = vcmp.eq.s32.totalorder %v3859_v0, 0  ;;  %vm5487_vm11 = vcmp.eq.s32.totalorder %v3859_v0, 1 }
  0x79   : > { %637 = vmatpush1.bf16.msra.mxu0 %v2993_v4  ;;  %778 = vmatpush1.bf16.msra.mxu1 %v2993_v4 }
  0x7a   : > { %638 = vmatprep.subr.bf16.mxu0 %v2994_v5  ;;  %779 = vmatprep.subr.bf16.mxu1 %v2994_v5 }
  0x7d   : > { %639 = vmatpush1.bf16.msra.mxu0 %v2996_v6  ;;  %780 = vmatpush1.bf16.msra.mxu1 %v2996_v6  ;;  %v4075_v6 = vld [vmem:[#allocation7 + $0x80] sm:$0xff] }
  0x7e   : > { %640 = vmatprep.subr.bf16.mxu0 %v2997_v7  ;;  %781 = vmatprep.subr.bf16.mxu1 %v2997_v7  ;;  %5553 = vst [vmem:[#allocation32_spill] sm:$0xff] %v4075_v6 }
  0x81   : > { %641 = vmatpush1.bf16.msra.mxu0 %v2999_v8  ;;  %782 = vmatpush1.bf16.msra.mxu1 %v2999_v8 }
  0x82   : > { %642 = vmatprep.subr.bf16.mxu0 %v3000_v9  ;;  %783 = vmatprep.subr.bf16.mxu1 %v3000_v9 }
  0x85   : > { %643 = vmatpush1.bf16.msra.mxu0 %v3002_v10  ;;  %784 = vmatpush1.bf16.msra.mxu1 %v3002_v10 }
  0x86   : > { %644 = vmatprep.subr.bf16.mxu0 %v3003_v11  ;;  %785 = vmatprep.subr.bf16.mxu1 %v3003_v11 }
  0x89   : > { %645 = vmatpush1.bf16.msra.mxu0 %v3005_v12  ;;  %786 = vmatpush1.bf16.msra.mxu1 %v3005_v12  ;;  %v3895_v12 = vld [vmem:[#allocation7 + $0x30] sm:$0xff] }
  0x8a   : > { %646 = vmatprep.subr.bf16.mxu0 %v3006_v13  ;;  %787 = vmatprep.subr.bf16.mxu1 %v3006_v13  ;;  %vm5384_vm13 = vcmp.eq.s32.totalorder %v3895_v12, 0  ;;  %vm5389_vm15 = vcmp.eq.s32.totalorder %v3895_v12, 1 }
  0x8d   : > { %647 = vmatpush1.bf16.msra.mxu0 %v3008_v14  ;;  %788 = vmatpush1.bf16.msra.mxu1 %v3008_v14 }
  0x8e   : > { %648 = vmatprep.subr.bf16.mxu0 %v3009_v15  ;;  %789 = vmatprep.subr.bf16.mxu1 %v3009_v15  ;;  %v3902_v15 = vld [vmem:[#allocation7 + $0x38] sm:$0xff] }
  0x8f   : > { %vm5386_vm14 = vcmp.eq.s32.totalorder %v3902_v15, 0 }
  0x91   : > { %649 = vmatpush1.bf16.msra.mxu0 %v3011_v16  ;;  %790 = vmatpush1.bf16.msra.mxu1 %v3011_v16 }
  0x94   : > { %667 = vmatmul.mubr.bf16.vlgmr.msra.gmra.mrb[4].mxu0 %v2816_v19  ;;  %808 = vmatmul.mubr.bf16.vlgmr.msra.gmra.mrb[4].mxu1 %v2833_v20 }
  0x95   : > { %941 = vmatprep.mubr.f32.mxu0 %v3463_v21  ;;  %1078 = vmatprep.mubr.f32.mxu1 %v3463_v21 }
 0x147   : > { %v386_v22 = vpop.f32.mrb[0].mxu0  ;;  %v527_v23 = vpop.f32.mrb[0].mxu1 }
 0x148   : > { %v388_v24 = vpop.f32.mrb[1].mxu0  ;;  %v529_v25 = vpop.f32.mrb[1].mxu1 }
 0x149   : > { %v390_v27 = vpop.f32.mrb[2].mxu0  ;;  %v531_v28 = vpop.f32.mrb[2].mxu1  ;;  %877 = vmatprep.subr.mxu0 %v388_v24  ;;  %1014 = vmatprep.subr.mxu1 %v529_v25  ;;  %v3931_v24 = vld [vmem:[#allocation7 + $0x40] sm:$0xff] }
 0x14a   : > { %v391_v29 = vpop.f32.mrb[3].mxu0  ;;  %v532_v30 = vpop.f32.mrb[3].mxu1  ;;  %878 = vmatpush1.msra.mxu0 %v386_v22  ;;  %1015 = vmatpush1.msra.mxu1 %v527_v23  ;;  %v3938_v27 = vld [vmem:[#allocation7 + $0x48] sm:$0xff] }
 0x14b   : > { %2850 = vmatmul.mubr.msk.f32.vlgmr.msra.gmra.mrb[8].mxu0 %vm840_vm0, %v3641_v26  ;;  %2862 = vmatmul.mubr.msk.f32.vlgmr.msra.gmra.mrb[8].mxu1 %vm840_vm0, %v3641_v26 }
 0x14c   : > { %947 = vmatprep.mubr.f32.mxu0 %v3463_v21  ;;  %1084 = vmatprep.mubr.f32.mxu1 %v3463_v21 }
 0x14f   : > { %2851 = vmatmul.mubr.msk.f32.gmra.mrb[10].mxu0 %vm840_vm0, %v3651_v31  ;;  %2863 = vmatmul.mubr.msk.f32.gmra.mrb[10].mxu1 %vm840_vm0, %v3651_v31 }
 0x150   : > { %953 = vmatprep.mubr.f32.mxu0 %v3463_v21  ;;  %1090 = vmatprep.mubr.f32.mxu1 %v3463_v21 }
 0x153   : > { %2852 = vmatmul.mubr.msk.f32.gmra.mrb[12].mxu0 %vm840_vm0, %v3662_v32  ;;  %2864 = vmatmul.mubr.msk.f32.gmra.mrb[12].mxu1 %vm840_vm0, %v3662_v32 }
 0x154   : > { %959 = vmatprep.mubr.f32.mxu0 %v3463_v21  ;;  %1096 = vmatprep.mubr.f32.mxu1 %v3463_v21 }
 0x157   : > { %2853 = vmatmul.mubr.msk.f32.gmra.mrb[14].mxu0 %vm840_vm0, %v3673_v33  ;;  %2865 = vmatmul.mubr.msk.f32.gmra.mrb[14].mxu1 %vm840_vm0, %v3673_v33 }
 0x158   : > { %965 = vmatprep.mubr.f32.mxu0 %v3463_v21  ;;  %1102 = vmatprep.mubr.f32.mxu1 %v3463_v21 }
 0x15b   : > { %2854 = vmatmul.mubr.msk.f32.gmra.mrb[16].mxu0 %vm840_vm0, %v3684_v34  ;;  %2866 = vmatmul.mubr.msk.f32.gmra.mrb[16].mxu1 %vm840_vm0, %v3684_v34 }
 0x15c   : > { %971 = vmatprep.mubr.f32.mxu0 %v3463_v21  ;;  %1108 = vmatprep.mubr.f32.mxu1 %v3463_v21 }
 0x15f   : > { %2855 = vmatmul.mubr.msk.f32.gmra.mrb[18].mxu0 %vm840_vm0, %v3695_v35  ;;  %2867 = vmatmul.mubr.msk.f32.gmra.mrb[18].mxu1 %vm840_vm0, %v3695_v35 }
 0x160   : > { %977 = vmatprep.mubr.f32.mxu0 %v3463_v21  ;;  %1114 = vmatprep.mubr.f32.mxu1 %v3463_v21 }
 0x163   : > { %2856 = vmatmul.mubr.msk.f32.gmra.mrb[20].mxu0 %vm840_vm0, %v3706_v36  ;;  %2868 = vmatmul.mubr.msk.f32.gmra.mrb[20].mxu1 %vm840_vm0, %v3706_v36 }
 0x164   : > { %983 = vmatprep.mubr.f32.mxu0 %v3463_v21  ;;  %1120 = vmatprep.mubr.f32.mxu1 %v3463_v21 }
 0x167   : > { %v668_v38 = vpop.f32.mrb[4].mxu0  ;;  %v809_v39 = vpop.f32.mrb[4].mxu1  ;;  %2857 = vmatmul.mubr.msk.f32.gmra.mrb[22].mxu0 %vm840_vm0, %v3717_v37  ;;  %2869 = vmatmul.mubr.msk.f32.gmra.mrb[22].mxu1 %vm840_vm0, %v3717_v37 }
 0x168   : > { %v670_v40 = vpop.f32.mrb[5].mxu0  ;;  %v811_v41 = vpop.f32.mrb[5].mxu1  ;;  %989 = vmatprep.mubr.f32.mxu0 %v3463_v21  ;;  %1126 = vmatprep.mubr.f32.mxu1 %v3463_v21 }
 0x169   : > { %v672_v43 = vpop.f32.mrb[6].mxu0  ;;  %v813_v44 = vpop.f32.mrb[6].mxu1  ;;  %1151 = vmatprep.subr.mxu0 %v670_v40  ;;  %1288 = vmatprep.subr.mxu1 %v811_v41 }
 0x16a   : > { %v673_v45 = vpop.f32.mrb[7].mxu0  ;;  %v814_v46 = vpop.f32.mrb[7].mxu1  ;;  %1152 = vmatpush1.msra.mxu0 %v668_v38  ;;  %1289 = vmatpush1.msra.mxu1 %v809_v39  ;;  %v3974_v39 = vld [vmem:[#allocation7 + $0x58] sm:$0xff] }
 0x16b   : > { %2858 = vmatmul.mubr.msk.f32.gmra.mrb[24].mxu0 %vm840_vm0, %v828_v42  ;;  %2870 = vmatmul.mubr.msk.f32.gmra.mrb[24].mxu1 %vm840_vm0, %v828_v42  ;;  %5535 = vst [vmem:[#allocation14_spill] sm:$0xff] %v3974_v39 }
 0x16c   : > { %995 = vmatprep.mubr.f32.mxu0 %v3463_v21  ;;  %1132 = vmatprep.mubr.f32.mxu1 %v3463_v21 }
 0x16f   : > { %2859 = vmatmul.mubr.msk.f32.gmra.mrb[26].mxu0 %vm840_vm0, %v829_v47  ;;  %2871 = vmatmul.mubr.msk.f32.gmra.mrb[26].mxu1 %vm840_vm0, %v829_v47 }
 0x170   : > { %1001 = vmatprep.mubr.f32.mxu0 %v3463_v21  ;;  %1138 = vmatprep.mubr.f32.mxu1 %v3463_v21 }
 0x173   : > { %2860 = vmatmul.mubr.msk.f32.gmra.mrb[28].mxu0 %vm840_vm0, %v830_v48  ;;  %2872 = vmatmul.mubr.msk.f32.gmra.mrb[28].mxu1 %vm840_vm0, %v830_v48 }
 0x174   : > { %1007 = vmatprep.mubr.f32.mxu0 %v3463_v21  ;;  %1144 = vmatprep.mubr.f32.mxu1 %v3463_v21 }
 0x177   : > { %2861 = vmatmul.mubr.msk.f32.gmra.mrb[30].mxu0 %vm840_vm0, %v831_v49  ;;  %2873 = vmatmul.mubr.msk.f32.gmra.mrb[30].mxu1 %vm840_vm0, %v831_v49 }
 0x178   : > { %1215 = vmatprep.mubr.f32.mxu0 %v3463_v21  ;;  %1352 = vmatprep.mubr.f32.mxu1 %v3463_v21 }
 0x17b   : > { %2874 = vmatmul.mubr.msk.f32.vlgmr.msra.gmra.mrb[32].mxu0 %vm840_vm0, %v3641_v26  ;;  %2886 = vmatmul.mubr.msk.f32.vlgmr.msra.gmra.mrb[32].mxu1 %vm840_vm0, %v3641_v26 }
 0x17c   : > { %1221 = vmatprep.mubr.f32.mxu0 %v3463_v21  ;;  %1358 = vmatprep.mubr.f32.mxu1 %v3463_v21 }
 0x17f   : > { %2875 = vmatmul.mubr.msk.f32.gmra.mrb[34].mxu0 %vm840_vm0, %v3651_v31  ;;  %2887 = vmatmul.mubr.msk.f32.gmra.mrb[34].mxu1 %vm840_vm0, %v3651_v31 }
 0x180   : > { %1227 = vmatprep.mubr.f32.mxu0 %v3463_v21  ;;  %1364 = vmatprep.mubr.f32.mxu1 %v3463_v21 }
 0x183   : > { %2876 = vmatmul.mubr.msk.f32.gmra.mrb[36].mxu0 %vm840_vm0, %v3662_v32  ;;  %2888 = vmatmul.mubr.msk.f32.gmra.mrb[36].mxu1 %vm840_vm0, %v3662_v32 }
 0x184   : > { %1233 = vmatprep.mubr.f32.mxu0 %v3463_v21  ;;  %1370 = vmatprep.mubr.f32.mxu1 %v3463_v21 }
 0x187   : > { %2877 = vmatmul.mubr.msk.f32.gmra.mrb[38].mxu0 %vm840_vm0, %v3673_v33  ;;  %2889 = vmatmul.mubr.msk.f32.gmra.mrb[38].mxu1 %vm840_vm0, %v3673_v33 }
 0x188   : > { %1239 = vmatprep.mubr.f32.mxu0 %v3463_v21  ;;  %1376 = vmatprep.mubr.f32.mxu1 %v3463_v21 }
 0x18b   : > { %2878 = vmatmul.mubr.msk.f32.gmra.mrb[40].mxu0 %vm840_vm0, %v3684_v34  ;;  %2890 = vmatmul.mubr.msk.f32.gmra.mrb[40].mxu1 %vm840_vm0, %v3684_v34 }
 0x18c   : > { %1245 = vmatprep.mubr.f32.mxu0 %v3463_v21  ;;  %1382 = vmatprep.mubr.f32.mxu1 %v3463_v21 }
 0x18f   : > { %2879 = vmatmul.mubr.msk.f32.gmra.mrb[42].mxu0 %vm840_vm0, %v3695_v35  ;;  %2891 = vmatmul.mubr.msk.f32.gmra.mrb[42].mxu1 %vm840_vm0, %v3695_v35 }
 0x190   : > { %1251 = vmatprep.mubr.f32.mxu0 %v3463_v21  ;;  %1388 = vmatprep.mubr.f32.mxu1 %v3463_v21 }
 0x193   : > { %2880 = vmatmul.mubr.msk.f32.gmra.mrb[44].mxu0 %vm840_vm0, %v3706_v36  ;;  %2892 = vmatmul.mubr.msk.f32.gmra.mrb[44].mxu1 %vm840_vm0, %v3706_v36  ;;  %v3967_v36 = vld [vmem:[#allocation7 + $0x50] sm:$0xff] }
 0x194   : > { %1257 = vmatprep.mubr.f32.mxu0 %v3463_v21  ;;  %1394 = vmatprep.mubr.f32.mxu1 %v3463_v21  ;;  %5534 = vst [vmem:[#allocation13_spill] sm:$0xff] %v3967_v36 }
 0x197   : > { %2881 = vmatmul.mubr.msk.f32.gmra.mrb[46].mxu0 %vm840_vm0, %v3717_v37  ;;  %2893 = vmatmul.mubr.msk.f32.gmra.mrb[46].mxu1 %vm840_vm0, %v3717_v37 }
 0x198   : > { %1263 = vmatprep.mubr.f32.mxu0 %v3463_v21  ;;  %1400 = vmatprep.mubr.f32.mxu1 %v3463_v21 }
 0x19b   : > { %2882 = vmatmul.mubr.msk.f32.gmra.mrb[48].mxu0 %vm840_vm0, %v828_v42  ;;  %2894 = vmatmul.mubr.msk.f32.gmra.mrb[48].mxu1 %vm840_vm0, %v828_v42  ;;  %v4046_v42 = vld [vmem:[#allocation7 + $0x78] sm:$0xff] }
 0x19c   : > { %1269 = vmatprep.mubr.f32.mxu0 %v3463_v21  ;;  %1406 = vmatprep.mubr.f32.mxu1 %v3463_v21  ;;  %5548 = vst [vmem:[#allocation27_spill] sm:$0xff] %v4046_v42 }
 0x19f   : > { %2883 = vmatmul.mubr.msk.f32.gmra.mrb[50].mxu0 %vm840_vm0, %v829_v47  ;;  %2895 = vmatmul.mubr.msk.f32.gmra.mrb[50].mxu1 %vm840_vm0, %v829_v47 }
 0x1a0   : > { %1275 = vmatprep.mubr.f32.mxu0 %v3463_v21  ;;  %1412 = vmatprep.mubr.f32.mxu1 %v3463_v21 }
 0x1a3   : > { %2884 = vmatmul.mubr.msk.f32.gmra.mrb[52].mxu0 %vm840_vm0, %v830_v48  ;;  %2896 = vmatmul.mubr.msk.f32.gmra.mrb[52].mxu1 %vm840_vm0, %v830_v48  ;;  %v4003_v48 = vld [vmem:[#allocation7 + $0x60] sm:$0xff] }
 0x1a4   : > { %1281 = vmatprep.mubr.f32.mxu0 %v3463_v21  ;;  %1418 = vmatprep.mubr.f32.mxu1 %v3463_v21  ;;  %5537 = vst [vmem:[#allocation16_spill] sm:$0xff] %v4003_v48 }
 0x1a7   : > { %2885 = vmatmul.mubr.msk.f32.gmra.mrb[54].mxu0 %vm840_vm0, %v831_v49  ;;  %2897 = vmatmul.mubr.msk.f32.gmra.mrb[54].mxu1 %vm840_vm0, %v831_v49  ;;  %vm5387_vm0 = vcmp.eq.s32.totalorder %v3902_v15, 1 }
 0x21e   : > { %v3825_v53 = vpop.f32.mrb[8].mxu0  ;;  %v3827_v54 = vpop.f32.mrb[8].mxu1 }
 0x21f   : > { %v1857_v56 = vsel %vm1809_vm1, %v3825_v53, 0.0  ;;  %v3835_v57 = vpop.f32.mrb[9].mxu0  ;;  %v3839_v59 = vpop.f32.mrb[9].mxu1 }
 0x220   : > { %v1858_v60 = vsel %vm1810_vm2, %v3835_v57, 0.0  ;;  %v3847_v61 = vsel %vm1977_vm3, %v3827_v54, %v1857_v56 }
 0x221   : > { %v3855_v63 = vsel %vm1978_vm4, %v3839_v59, %v1858_v60  ;;  %v4010_v60 = vld [vmem:[#allocation7 + $0x68] sm:$0xff] }
 0x222   : > { %v3861_v1 = vpop.f32.mrb[10].mxu0  ;;  %v3863_v2 = vpop.f32.mrb[10].mxu1  ;;  %5540 = vst [vmem:[#allocation19_spill] sm:$0xff] %v4010_v60 }
 0x223   : > { %v1859_v4 = vsel %vm1811_vm5, %v3861_v1, 0.0  ;;  %v3871_v5 = vpop.f32.mrb[11].mxu0  ;;  %v3875_v7 = vpop.f32.mrb[11].mxu1 }
 0x224   : > { %v1860_v8 = vsel %vm5496_vm6, %v3871_v5, 0.0  ;;  %v3883_v9 = vsel %vm5501_vm7, %v3863_v2, %v1859_v4  ;;  %vm2150_vm6 = vcmp.eq.s32.totalorder %v3866_v3, 2  ;;  %vm2317_vm7 = vcmp.eq.s32.totalorder %v3859_v0, 3 }
 0x225   : > { %v3891_v11 = vsel %vm5491_vm8, %v3875_v7, %v1860_v8  ;;  %vm5510_vm8 = vcmp.eq.s32.totalorder %v3859_v0, 2 }
 0x226   : > { %v3897_v13 = vpop.f32.mrb[12].mxu0  ;;  %v3899_v14 = vpop.f32.mrb[12].mxu1 }
 0x227   : > { %v1861_v16 = vsel %vm5488_vm9, %v3897_v13, 0.0  ;;  %v3907_v17 = vpop.f32.mrb[13].mxu0  ;;  %v3911_v19 = vpop.f32.mrb[13].mxu1  ;;  %vm2316_vm9 = vcmp.eq.s32.totalorder %v3830_v55, 3 }
 0x228   : > { %v1862_v20 = vsel %vm5385_vm10, %v3907_v17, 0.0  ;;  %v3919_v21 = vsel %vm5487_vm11, %v3899_v14, %v1861_v16  ;;  %vm5393_vm10 = vcmp.eq.s32.totalorder %v3931_v24, 1  ;;  %v4039_v16 = vld [vmem:[#allocation7 + $0x70] sm:$0xff]  ;;  %vm2315_vm11 = vcmp.eq.s32.totalorder %v3823_v52, 3 }
 0x229   : > { %v3927_v23 = vsel %vm5383_vm12, %v3911_v19, %v1862_v20  ;;  %vm5388_vm12 = vcmp.eq.s32.totalorder %v3931_v24, 0  ;;  %5545 = vst [vmem:[#allocation24_spill] sm:$0xff] %v4039_v16 }
 0x22a   : > { %v3933_v25 = vpop.f32.mrb[14].mxu0  ;;  %v3935_v26 = vpop.f32.mrb[14].mxu1 }
 0x22b   : > { %v1863_v28 = vsel %vm5384_vm13, %v3933_v25, 0.0  ;;  %v3943_v29 = vpop.f32.mrb[15].mxu0  ;;  %v3947_v31 = vpop.f32.mrb[15].mxu1  ;;  %vm5390_vm13 = vcmp.eq.s32.totalorder %v3938_v27, 0 }
 0x22c   : > { %v1864_v32 = vsel %vm5386_vm14, %v3943_v29, 0.0  ;;  %v3955_v33 = vsel %vm5389_vm15, %v3935_v26, %v1863_v28  ;;  %vm5391_vm14 = vcmp.eq.s32.totalorder %v3938_v27, 1  ;;  %vm5397_vm15 = vcmp.eq.s32.totalorder %v3967_v36, 1 }
 0x22d   : > { %v3963_v35 = vsel %vm5387_vm0, %v3947_v31, %v1864_v32  ;;  %vm5392_vm0 = vcmp.eq.s32.totalorder %v3967_v36, 0 }
 0x22e   : > { %v3969_v37 = vpop.f32.mrb[16].mxu0  ;;  %v3971_v38 = vpop.f32.mrb[16].mxu1 }
 0x22f   : > { %v1865_v40 = vsel %vm5388_vm12, %v3969_v37, 0.0  ;;  %v3979_v41 = vpop.f32.mrb[17].mxu0  ;;  %v3983_v43 = vpop.f32.mrb[17].mxu1  ;;  %vm5394_vm12 = vcmp.eq.s32.totalorder %v3974_v39, 0 }
 0x230   : > { %v1866_v44 = vsel %vm5390_vm13, %v3979_v41, 0.0  ;;  %v3991_v45 = vsel %vm5393_vm10, %v3971_v38, %v1865_v40  ;;  %vm5395_vm13 = vcmp.eq.s32.totalorder %v3974_v39, 1  ;;  %vm5409_vm10 = vcmp.eq.s32.totalorder %v4003_v48, 1 }
 0x231   : > { %v3999_v47 = vsel %vm5391_vm14, %v3983_v43, %v1866_v44  ;;  %vm5396_vm14 = vcmp.eq.s32.totalorder %v4003_v48, 0 }
 0x232   : > { %5536 = vst [vmem:[#allocation15_spill] sm:$0xff] %v3999_v47  ;;  %v4005_v49 = vpop.f32.mrb[18].mxu0  ;;  %v4007_v56 = vpop.f32.mrb[18].mxu1 }
 0x233   : > { %5538 = vst [vmem:[#allocation17_spill] sm:$0xff] %v4005_v49  ;;  %5539 = vst [vmem:[#allocation18_spill] sm:$0xff] %v4007_v56  ;;  %v1867_v4 = vsel %vm5392_vm0, %v4005_v49, 0.0  ;;  %v4015_v8 = vpop.f32.mrb[19].mxu0  ;;  %v4019_v20 = vpop.f32.mrb[19].mxu1  ;;  %vm5398_vm0 = vcmp.eq.s32.totalorder %v4010_v60, 0 }
 0x234   : > { %5541 = vst [vmem:[#allocation20_spill] sm:$0xff] %v4015_v8  ;;  %5542 = vst [vmem:[#allocation21_spill] sm:$0xff] %v4019_v20  ;;  %v1868_v28 = vsel %vm5394_vm12, %v4015_v8, 0.0  ;;  %v4027_v32 = vsel %vm5397_vm15, %v4007_v56, %v1867_v4  ;;  %vm5405_vm12 = vcmp.eq.s32.totalorder %v4010_v60, 1  ;;  %vm5423_vm15 = vcmp.eq.s32.totalorder %v4039_v16, 1 }
 0x235   : > { %5543 = vst [vmem:[#allocation22_spill] sm:$0xff] %v4027_v32  ;;  %v4035_v44 = vsel %vm5395_vm13, %v4019_v20, %v1868_v28  ;;  %vm5408_vm13 = vcmp.eq.s32.totalorder %v4039_v16, 0  ;;  %v4118_v16 = vld [vmem:[#allocation7 + $0x98] sm:$0xff]  ;;  %v5593_v20 = vmax.f32 %v3861_v1, %v3863_v2 }
 0x236   : > { %5544 = vst [vmem:[#allocation23_spill] sm:$0xff] %v4035_v44  ;;  %v4041_v46 = vpop.f32.mrb[20].mxu0  ;;  %v4043_v4 = vpop.f32.mrb[20].mxu1  ;;  %5564 = vst [vmem:[#allocation43_spill] sm:$0xff] %v4118_v16 }
 0x237   : > { %5546 = vst [vmem:[#allocation25_spill] sm:$0xff] %v4041_v46  ;;  %5547 = vst [vmem:[#allocation26_spill] sm:$0xff] %v4043_v4  ;;  %v1869_v40 = vsel %vm5396_vm14, %v4041_v46, 0.0  ;;  %v4051_v28 = vpop.f32.mrb[21].mxu0  ;;  %v4055_v30 = vpop.f32.mrb[21].mxu1  ;;  %vm5412_vm14 = vcmp.eq.s32.totalorder %v4046_v42, 0 }
 0x238   : > { %5549 = vst [vmem:[#allocation28_spill] sm:$0xff] %v4051_v28  ;;  %5550 = vst [vmem:[#allocation29_spill] sm:$0xff] %v4055_v30  ;;  %v1870_v22 = vsel %vm5398_vm0, %v4051_v28, 0.0  ;;  %v4063_v18 = vsel %vm5409_vm10, %v4043_v4, %v1869_v40  ;;  %vm5421_vm0 = vcmp.eq.s32.totalorder %v4046_v42, 1  ;;  %vm5439_vm10 = vcmp.eq.s32.totalorder %v4075_v6, 1 }
 0x239   : > { %5551 = vst [vmem:[#allocation30_spill] sm:$0xff] %v4063_v18  ;;  %v4071_v34 = vsel %vm5405_vm12, %v4055_v30, %v1870_v22  ;;  %vm5422_vm12 = vcmp.eq.s32.totalorder %v4075_v6, 0  ;;  %v4154_v6 = vld [vmem:[#allocation7 + $0xa8] sm:$0xff] }
 0x23a   : > { %5552 = vst [vmem:[#allocation31_spill] sm:$0xff] %v4071_v34  ;;  %v4077_v62 = vpop.f32.mrb[22].mxu0  ;;  %v4079_v40 = vpop.f32.mrb[22].mxu1  ;;  %5572 = vst [vmem:[#allocation51_spill] sm:$0xff] %v4154_v6 }
 0x23b   : > { %5554 = vst [vmem:[#allocation33_spill] sm:$0xff] %v4077_v62  ;;  %5555 = vst [vmem:[#allocation34_spill] sm:$0xff] %v4079_v40  ;;  %v1871_v10 = vsel %vm5408_vm13, %v4077_v62, 0.0  ;;  %v4087_v22 = vpop.f32.mrb[23].mxu0  ;;  %v4091_v48 = vpop.f32.mrb[23].mxu1  ;;  %vm5428_vm13 = vcmp.eq.s32.totalorder %v4082_v58, 0 }
 0x23c   : > { %5557 = vst [vmem:[#allocation36_spill] sm:$0xff] %v4087_v22  ;;  %5558 = vst [vmem:[#allocation37_spill] sm:$0xff] %v4091_v48  ;;  %v1872_v34 = vsel %vm5412_vm14, %v4087_v22, 0.0  ;;  %v4099_v30 = vsel %vm5423_vm15, %v4079_v40, %v1871_v10  ;;  %v4111_v62 = vld [vmem:[#allocation7 + $0x90] sm:$0xff]  ;;  %vm5437_vm14 = vcmp.eq.s32.totalorder %v4082_v58, 1 }
 0x23d   : > { %5559 = vst [vmem:[#allocation38_spill] sm:$0xff] %v4099_v30  ;;  %v4107_v60 = vsel %vm5421_vm0, %v4091_v48, %v1872_v34  ;;  %5561 = vst [vmem:[#allocation40_spill] sm:$0xff] %v4111_v62  ;;  %vm5438_vm0 = vcmp.eq.s32.totalorder %v4111_v62, 0  ;;  %vm5455_vm15 = vcmp.eq.s32.totalorder %v4111_v62, 1  ;;  %v4190_v62 = vld [vmem:[#allocation7 + $0xb8] sm:$0xff] }
 0x23e   : > { %5560 = vst [vmem:[#allocation39_spill] sm:$0xff] %v4107_v60  ;;  %v4113_v18 = vpop.f32.mrb[24].mxu0  ;;  %v4115_v10 = vpop.f32.mrb[24].mxu1  ;;  %5580 = vst [vmem:[#allocation59_spill] sm:$0xff] %v4190_v62 }
 0x23f   : > { %5562 = vst [vmem:[#allocation41_spill] sm:$0xff] %v4113_v18  ;;  %5563 = vst [vmem:[#allocation42_spill] sm:$0xff] %v4115_v10  ;;  %v1873_v28 = vsel %vm5422_vm12, %v4113_v18, 0.0  ;;  %v4123_v34 = vpop.f32.mrb[25].mxu0  ;;  %v4127_v60 = vpop.f32.mrb[25].mxu1  ;;  %vm5444_vm12 = vcmp.eq.s32.totalorder %v4118_v16, 0 }
 0x240   : > { %5565 = vst [vmem:[#allocation44_spill] sm:$0xff] %v4123_v34  ;;  %5566 = vst [vmem:[#allocation45_spill] sm:$0xff] %v4127_v60  ;;  %v1874_v48 = vsel %vm5428_vm13, %v4123_v34, 0.0  ;;  %v4135_v22 = vsel %vm5439_vm10, %v4115_v10, %v1873_v28  ;;  %v4147_v18 = vld [vmem:[#allocation7 + $0xa0] sm:$0xff]  ;;  %vm5453_vm13 = vcmp.eq.s32.totalorder %v4118_v16, 1 }
 0x241   : > { %5567 = vst [vmem:[#allocation46_spill] sm:$0xff] %v4135_v22  ;;  %v4143_v42 = vsel %vm5437_vm14, %v4127_v60, %v1874_v48  ;;  %5569 = vst [vmem:[#allocation48_spill] sm:$0xff] %v4147_v18  ;;  %vm5454_vm14 = vcmp.eq.s32.totalorder %v4147_v18, 0  ;;  %vm5469_vm10 = vcmp.eq.s32.totalorder %v4147_v18, 1 }
 0x242   : > { %5568 = vst [vmem:[#allocation47_spill] sm:$0xff] %v4143_v42  ;;  %v4149_v40 = vpop.f32.mrb[26].mxu0  ;;  %v4151_v28 = vpop.f32.mrb[26].mxu1 }
 0x243   : > { %5570 = vst [vmem:[#allocation49_spill] sm:$0xff] %v4149_v40  ;;  %5571 = vst [vmem:[#allocation50_spill] sm:$0xff] %v4151_v28  ;;  %v1875_v30 = vsel %vm5438_vm0, %v4149_v40, 0.0  ;;  %v4159_v48 = vpop.f32.mrb[27].mxu0  ;;  %v4163_v42 = vpop.f32.mrb[27].mxu1  ;;  %vm5460_vm0 = vcmp.eq.s32.totalorder %v4154_v6, 0 }
 0x244   : > { %5573 = vst [vmem:[#allocation52_spill] sm:$0xff] %v4159_v48  ;;  %5574 = vst [vmem:[#allocation53_spill] sm:$0xff] %v4163_v42  ;;  %v1876_v60 = vsel %vm5444_vm12, %v4159_v48, 0.0  ;;  %v4171_v34 = vsel %vm5455_vm15, %v4151_v28, %v1875_v30  ;;  %v4183_v40 = vld [vmem:[#allocation7 + $0xb0] sm:$0xff]  ;;  %vm5468_vm12 = vcmp.eq.s32.totalorder %v4154_v6, 1 }
 0x245   : > { %5575 = vst [vmem:[#allocation54_spill] sm:$0xff] %v4171_v34  ;;  %v4179_v58 = vsel %vm5453_vm13, %v4163_v42, %v1876_v60  ;;  %5577 = vst [vmem:[#allocation56_spill] sm:$0xff] %v4183_v40  ;;  %vm5467_vm13 = vcmp.eq.s32.totalorder %v4183_v40, 0  ;;  %vm5486_vm15 = vcmp.eq.s32.totalorder %v4183_v40, 1 }
 0x246   : > { %5576 = vst [vmem:[#allocation55_spill] sm:$0xff] %v4179_v58  ;;  %v4185_v10 = vpop.f32.mrb[28].mxu0  ;;  %v4187_v30 = vpop.f32.mrb[28].mxu1 }
 0x247   : > { %5578 = vst [vmem:[#allocation57_spill] sm:$0xff] %v4185_v10  ;;  %5579 = vst [vmem:[#allocation58_spill] sm:$0xff] %v4187_v30  ;;  %v1877_v22 = vsel %vm5454_vm14, %v4185_v10, 0.0  ;;  %v4195_v60 = vpop.f32.mrb[29].mxu0  ;;  %v4199_v58 = vpop.f32.mrb[29].mxu1  ;;  %vm5474_vm14 = vcmp.eq.s32.totalorder %v4190_v62, 0 }
 0x248   : > { %5581 = vst [vmem:[#allocation60_spill] sm:$0xff] %v4195_v60  ;;  %5582 = vst [vmem:[#allocation61_spill] sm:$0xff] %v4199_v58  ;;  %v1878_v42 = vsel %vm5460_vm0, %v4195_v60, 0.0  ;;  %v4207_v48 = vsel %vm5469_vm10, %v4187_v30, %v1877_v22  ;;  %vm5485_vm0 = vcmp.eq.s32.totalorder %v4190_v62, 1  ;;  %vm2313_vm10 = vcmp.eq.s32.totalorder %v3816_v50, 3 }
 0x249   : > { %5583 = vst [vmem:[#allocation62_spill] sm:$0xff] %v4207_v48  ;;  %v4215_v16 = vsel %vm5468_vm12, %v4199_v58, %v1878_v42  ;;  %vm2146_vm12 = vcmp.eq.s32.totalorder %v3818_v51, 2 }
 0x24a   : > { %5584 = vst [vmem:[#allocation63_spill] sm:$0xff] %v4215_v16  ;;  %v4219_v10 = vpop.f32.mrb[30].mxu0  ;;  %v4221_v28 = vpop.f32.mrb[30].mxu1 }
 0x24b   : > { %5585 = vst [vmem:[#allocation64_spill] sm:$0xff] %v4219_v10  ;;  %5586 = vst [vmem:[#allocation65_spill] sm:$0xff] %v4221_v28  ;;  %v1879_v22 = vsel %vm5467_vm13, %v4219_v10, 0.0  ;;  %v4227_v34 = vpop.f32.mrb[31].mxu0  ;;  %v4231_v6 = vpop.f32.mrb[31].mxu1  ;;  %vm2145_vm13 = vcmp.eq.s32.totalorder %v3816_v50, 2 }
 0x24c   : > { %5587 = vst [vmem:[#allocation66_spill] sm:$0xff] %v4227_v34  ;;  %5588 = vst [vmem:[#allocation67_spill] sm:$0xff] %v4231_v6  ;;  %v1880_v18 = vsel %vm5474_vm14, %v4227_v34, 0.0  ;;  %v4239_v16 = vsel %vm5486_vm15, %v4221_v28, %v1879_v22  ;;  %vm2314_vm14 = vcmp.eq.s32.totalorder %v3818_v51, 3  ;;  %v5591_v22 = vmax.f32 %v3825_v53, %v3827_v54 }
 0x24d   : > { %5589 = vst [vmem:[#allocation68_spill] sm:$0xff] %v4239_v16  ;;  %v4247_v42 = vsel %vm5485_vm0, %v4231_v6, %v1880_v18  ;;  %v5592_v18 = vmax.f32 %v3835_v57, %v3839_v59  ;;  %vm2147_vm0 = vcmp.eq.s32.totalorder %v3823_v52, 2  ;;  %vm2148_vm15 = vcmp.eq.s32.totalorder %v3830_v55, 2 }
 0x24e   : > { %5590 = vst [vmem:[#allocation69_spill] sm:$0xff] %v4247_v42  ;;  %v1217_v10 = vpop.f32.mrb[32].mxu0  ;;  %v1354_v60 = vpop.f32.mrb[32].mxu1 }
 0x24f   : > { %v1641_v40 = vmax.f32 %v5591_v22, %v1217_v10  ;;  %v2193_v58 = vsel %vm2145_vm13, %v1217_v10, %v3847_v61  ;;  %v1219_v34 = vpop.f32.mrb[33].mxu0  ;;  %v1356_v62 = vpop.f32.mrb[33].mxu1 }
 0x250   : > { %v1642_v42 = vmax.f32 %v5592_v18, %v1219_v34  ;;  %v2194_v6 = vsel %vm2146_vm12, %v1219_v34, %v3855_v63  ;;  %v4266_v16 = vsel %vm2313_vm10, %v1354_v60, %v2193_v58 }
 0x251   : > { %v4268_v28 = vmax.f32 %v1641_v40, %v1354_v60  ;;  %v4272_v22 = vsel %vm2314_vm14, %v1356_v62, %v2194_v6 }
 0x252   : > { %v4275_v61 = vmax.f32 %v1642_v42, %v1356_v62  ;;  %v1223_v48 = vpop.f32.mrb[34].mxu0  ;;  %v1360_v18 = vpop.f32.mrb[34].mxu1 }
 0x253   : > { %v1713_v58 = vsub.f32 %v3825_v53, %v4268_v28  ;;  %v1881_v63 = vsub.f32 %v3827_v54, %v4268_v28  ;;  %v2049_v6 = vsub.f32 %v1217_v10, %v4268_v28  ;;  %v2217_v40 = vsub.f32 %v1354_v60, %v4268_v28  ;;  %v4286_v42 = vpop.f32.mrb[35].mxu0  ;;  %v4288_v30 = vpop.f32.mrb[35].mxu1 }
 0x254   : > { %v1714_v4 = vsub.f32 %v3835_v57, %v4275_v61  ;;  %v1882_v46 = vsub.f32 %v3839_v59, %v4275_v61  ;;  %v2050_v53 = vsub.f32 %v1219_v34, %v4275_v61  ;;  %v2218_v54 = vsub.f32 %v1356_v62, %v4275_v61 }
 0x255   : > { %v1737_v10 = vmul.f32 1.442695, %v1713_v58  ;;  %v1905_v60 = vmul.f32 1.442695, %v1881_v63  ;;  %v2073_v44 = vmul.f32 1.442695, %v2049_v6  ;;  %v1643_v8 = vmax.f32 %v5593_v20, %v1223_v48 }
 0x256   : > { %v2241_v32 = vmul.f32 1.442695, %v2217_v40  ;;  %v1739_v57 = vmul.f32 1.442695, %v1714_v4  ;;  %v1907_v39 = vmul.f32 1.442695, %v1882_v46  ;;  %v2195_v59 = vsel %vm2147_vm0, %v1223_v48, %v3883_v9 }
 0x257   : > { %3012 = vpow2.f32 %v1737_v10  ;;  %v2075_v62 = vmul.f32 1.442695, %v2050_v53  ;;  %v2243_v34 = vmul.f32 1.442695, %v2218_v54  ;;  %v5594_v58 = vmax.f32 %v3871_v5, %v3875_v7  ;;  %v4309_v6 = vpop.f32.mrb[36].mxu0  ;;  %v4311_v20 = vpop.f32.mrb[36].mxu1 }
 0x258   : > { %3014 = vpow2.f32 %v1905_v60  ;;  %v2196_v46 = vsel %vm2148_vm15, %v4286_v42, %v3891_v11  ;;  %v4317_v4 = vmax.f32 %v1643_v8, %v1360_v18  ;;  %v4321_v9 = vsel %vm2315_vm11, %v1360_v18, %v2195_v59  ;;  %v4323_v40 = vpop.f32.mrb[37].mxu0  ;;  %v4325_v53 = vpop.f32.mrb[37].mxu1 }
 0x259   : > { %v1644_v63 = vmax.f32 %v5594_v58, %v4286_v42  ;;  %3016 = vpow2.f32 %v2073_v44  ;;  %v4333_v10 = vsel %vm2316_vm9, %v4288_v30, %v2196_v46  ;;  %v5595_v11 = vmax.f32 %v3897_v13, %v3899_v14 }
 0x25a   : > { %3018 = vpow2.f32 %v2241_v32  ;;  %v1715_v60 = vsub.f32 %v3861_v1, %v4317_v4  ;;  %v1883_v44 = vsub.f32 %v3863_v2, %v4317_v4  ;;  %v2051_v59 = vsub.f32 %v1223_v48, %v4317_v4  ;;  %v4344_v58 = vpop.f32.mrb[38].mxu0 }
 0x25b   : > { %v4328_v54 = vmax.f32 %v1644_v63, %v4288_v30  ;;  %v1645_v8 = vmax.f32 %v5595_v11, %v4309_v6  ;;  %v4346_v63 = vpop.f32.mrb[38].mxu1  ;;  %3020 = vpow2.f32 %v1739_v57  ;;  %v2219_v46 = vsub.f32 %v1360_v18, %v4317_v4  ;;  %v4353_v11 = vpop.f32.mrb[39].mxu0 }
 0x25c   : > { %v4355_v1 = vpop.f32.mrb[39].mxu1  ;;  %3022 = vpow2.f32 %v1907_v39  ;;  %v1741_v2 = vmul.f32 1.442695, %v1715_v60  ;;  %v1909_v48 = vmul.f32 1.442695, %v1883_v44 }
 0x25d   : > { %v1716_v36 = vsub.f32 %v3871_v5, %v4328_v54  ;;  %v1884_v32 = vsub.f32 %v3875_v7, %v4328_v54  ;;  %v2077_v56 = vmul.f32 1.442695, %v2051_v59  ;;  %3024 = vpow2.f32 %v2075_v62 }
 0x25e   : > { %v2245_v49 = vmul.f32 1.442695, %v2219_v46  ;;  %3026 = vpow2.f32 %v2243_v34  ;;  %v2052_v18 = vsub.f32 %v4286_v42, %v4328_v54  ;;  %v2220_v5 = vsub.f32 %v4288_v30, %v4328_v54  ;;  %v4365_v39 = vpop.f32.mrb[40].mxu0  ;;  %v4367_v60 = vpop.f32.mrb[40].mxu1 }
 0x25f   : > { %v1743_v47 = vmul.f32 1.442695, %v1716_v36  ;;  %v1911_v57 = vmul.f32 1.442695, %v1884_v32  ;;  %v2197_v7 = vsel %vm5510_vm8, %v4309_v6, %v3919_v21  ;;  %5596 = vst [vmem:[#allocation70_spill] sm:$0xff] %v4367_v60  ;;  %3028 = vpow2.f32 %v1741_v2  ;;  %v4383_v21 = vpop.f32.mrb[41].mxu0 }
 0x260   : > { %v5597_v36 = vmax.f32 %v3907_v17, %v3911_v19  ;;  %v4377_v30 = vsel %vm2150_vm6, %v4323_v40, %v3927_v23  ;;  %v4380_v42 = vmax.f32 %v1645_v8, %v4311_v20  ;;  %vm2318_vm8 = vcmp.eq.s32.totalorder %v3866_v3, 3  ;;  %v4385_v34 = vpop.f32.mrb[41].mxu1 }
 0x261   : > { %5598 = vst [vmem:[#allocation71_spill] sm:$0xff] %v4385_v34  ;;  %3030 = vpow2.f32 %v1909_v48  ;;  %v2079_v44 = vmul.f32 1.442695, %v2052_v18  ;;  %v2247_v59 = vmul.f32 1.442695, %v2220_v5  ;;  %v4390_v46 = vsel %vm2317_vm7, %v4311_v20, %v2197_v7  ;;  %v3013_v32 = vpop.eup %3012 }
 0x262   : > { %v1646_v62 = vmax.f32 %v5597_v36, %v4323_v40  ;;  %5599 = vst [vmem:[#allocation72_spill] sm:$0xff] %v4390_v46  ;;  %3032 = vpow2.f32 %v2077_v56  ;;  %v1717_v23 = vsub.f32 %v3897_v13, %v4380_v42  ;;  %v1885_v8 = vsub.f32 %v3899_v14, %v4380_v42  ;;  %v3015_v36 = vpop.eup %3014  ;;  %v4405_v56 = vpop.f32.mrb[42].mxu0 }
 0x263   : > { %v2053_v2 = vsub.f32 %v4309_v6, %v4380_v42  ;;  %v1833_v48 = vsel %vm1809_vm1, %v3013_v32, 0.0  ;;  %3034 = vpow2.f32 %v2245_v49  ;;  %v2221_v18 = vsub.f32 %v4311_v20, %v4380_v42  ;;  %5600 = vst [vmem:[#allocation73_spill] sm:$0xff] %v4405_v56  ;;  %v4407_v13 = vpop.f32.mrb[42].mxu1  ;;  %v3017_v7 = vpop.eup %3016 }
 0x264   : > { %v4403_v5 = vmax.f32 %v1646_v62, %v4325_v53  ;;  %5601 = vst [vmem:[#allocation74_spill] sm:$0xff] %v4407_v13  ;;  %v1953_v14 = vadd.f32 %v3015_v36, %v3013_v32  ;;  %v2001_v6 = vsel %vm1977_vm3, %v3015_v36, %v1833_v48  ;;  %3036 = vpow2.f32 %v1743_v47  ;;  %v4412_v49 = vpop.f32.mrb[43].mxu0  ;;  %v4414_v60 = vpop.f32.mrb[43].mxu1 }
 0x265   : > { %v1745_v34 = vmul.f32 1.442695, %v1717_v23  ;;  %vm2151_vm1 = vcmp.eq.s32.totalorder %v3895_v12, 2  ;;  %5602 = vst [vmem:[#allocation75_spill] sm:$0xff] %v4414_v60  ;;  %v3019_v20 = vpop.eup %3018  ;;  %v2169_v62 = vsel %vm2145_vm13, %v3017_v7, %v2001_v6  ;;  %3038 = vpow2.f32 %v1911_v57 }
 0x266   : > { %v1913_v56 = vmul.f32 1.442695, %v1885_v8  ;;  %v2081_v13 = vmul.f32 1.442695, %v2053_v2  ;;  %v3021_v46 = vpop.eup %3020  ;;  %v2121_v32 = vadd.f32 %v3017_v7, %v1953_v14  ;;  %v4420_v36 = vsel %vm2313_vm10, %v3019_v20, %v2169_v62  ;;  %v4430_v50 = vpop.f32.mrb[44].mxu0 }
 0x267   : > { %3040 = vpow2.f32 %v2079_v44  ;;  %v2249_v47 = vmul.f32 1.442695, %v2221_v18  ;;  %vm2152_vm3 = vcmp.eq.s32.totalorder %v3902_v15, 2  ;;  %v3023_v23 = vpop.eup %3022  ;;  %v1834_v48 = vsel %vm1810_vm2, %v3021_v46, 0.0  ;;  %5603 = vst [vmem:[#allocation76_spill] sm:$0xff] %v4430_v50  ;;  %v4432_v2 = vpop.f32.mrb[44].mxu1 }
 0x268   : > { %3042 = vpow2.f32 %v2247_v59  ;;  %v1718_v57 = vsub.f32 %v3907_v17, %v4403_v5  ;;  %v1886_v8 = vsub.f32 %v3911_v19, %v4403_v5  ;;  %vm2319_vm13 = vcmp.eq.s32.totalorder %v3895_v12, 3  ;;  %5604 = vst [vmem:[#allocation77_spill] sm:$0xff] %v4432_v2  ;;  %v3025_v44 = vpop.eup %3024  ;;  %v4436_v59 = vpop.f32.mrb[45].mxu0 }
 0x269   : > { %v2289_v18 = vadd.f32 %v3019_v20, %v2121_v32  ;;  %v1954_v7 = vadd.f32 %v3023_v23, %v3021_v46  ;;  %v2002_v14 = vsel %vm1978_vm4, %v3023_v23, %v1834_v48  ;;  %3044 = vpow2.f32 %v1745_v34  ;;  %v4438_v6 = vpop.f32.mrb[45].mxu1  ;;  %v3027_v17 = vpop.eup %3026 }
 0x26a   : > { %v2170_v19 = vsel %vm2146_vm12, %v3025_v44, %v2002_v14  ;;  %3046 = vpow2.f32 %v1913_v56  ;;  %v1747_v62 = vmul.f32 1.442695, %v1718_v57  ;;  %v1915_v50 = vmul.f32 1.442695, %v1886_v8  ;;  %v3029_v60 = vpop.eup %3028  ;;  %v4458_v51 = vpop.f32.mrb[46].mxu0 }
 0x26b   : > { %3048 = vrcp.f32 %v2289_v18  ;;  %v2122_v2 = vadd.f32 %v3025_v44, %v1954_v7  ;;  %v4444_v46 = vsel %vm2314_vm14, %v3027_v17, %v2170_v19  ;;  %v2054_v34 = vsub.f32 %v4323_v40, %v4403_v5  ;;  %v3031_v20 = vpop.eup %3030  ;;  %5605 = vst [vmem:[#allocation78_spill] sm:$0xff] %v4458_v51  ;;  %v4460_v48 = vpop.f32.mrb[46].mxu1 }
 0x26c   : > { %3050 = vlog2.f32 %v2289_v18  ;;  %v1835_v32 = vsel %vm1811_vm5, %v3029_v60, 0.0  ;;  %v2222_v56 = vsub.f32 %v4325_v53, %v4403_v5  ;;  %v4456_v23 = vsel %vm2318_vm8, %v4325_v53, %v4377_v30  ;;  %5606 = vst [vmem:[#allocation79_spill] sm:$0xff] %v4460_v48  ;;  %v3033_v57 = vpop.eup %3032  ;;  %v4464_v18 = vpop.f32.mrb[47].mxu0 }
 0x26d   : > { %v2290_v40 = vadd.f32 %v3027_v17, %v2122_v2  ;;  %v1955_v8 = vadd.f32 %v3031_v20, %v3029_v60  ;;  %vm5607_vm2 = vcmp.eq.s32.totalorder %v3823_v52, 1  ;;  %3052 = vpow2.f32 %v2081_v13  ;;  %v4466_v7 = vpop.f32.mrb[47].mxu1  ;;  %v3035_v14 = vpop.eup %3034 }
 0x26e   : > { %v2003_v44 = vsel %vm5607_vm2, %v3031_v20, %v1835_v32  ;;  %5608 = vst [vmem:[#allocation80_spill] sm:$0xff] %v4466_v7  ;;  %3054 = vpow2.f32 %v2249_v47  ;;  %v2083_v30 = vmul.f32 1.442695, %v2054_v34  ;;  %v2251_v19 = vmul.f32 1.442695, %v2222_v56  ;;  %v3037_v51 = vpop.eup %3036  ;;  %v4490_v32 = vpop.f32.mrb[48].mxu0 }
 0x26f   : > { %v2171_v53 = vsel %vm2147_vm0, %v3033_v57, %v2003_v44  ;;  %3056 = vrcp.f32 %v2290_v40  ;;  %v2123_v48 = vadd.f32 %v3033_v57, %v1955_v8  ;;  %v5609_v13 = vmax.f32 %v3933_v25, %v3935_v26  ;;  %v3039_v17 = vpop.eup %3038  ;;  %5612 = vst [vmem:[#allocation81_spill] sm:$0xff] %v4490_v32  ;;  %v4492_v56 = vpop.f32.mrb[48].mxu1 }
 0x270   : > { %v4472_v60 = vsel %vm2315_vm11, %v3035_v14, %v2171_v53  ;;  %3058 = vlog2.f32 %v2290_v40  ;;  %vm5610_vm4 = vcmp.eq.s32.totalorder %v3830_v55, 0  ;;  %v2199_v47 = vsel %vm2151_vm1, %v4344_v58, %v3955_v33  ;;  %5613 = vst [vmem:[#allocation82_spill] sm:$0xff] %v4492_v56  ;;  %v4496_v53 = vpop.f32.mrb[49].mxu0  ;;  %v4498_v33 = vpop.f32.mrb[49].mxu1 }
 0x271   : > { %v1647_v2 = vmax.f32 %v5609_v13, %v4344_v58  ;;  %v1836_v20 = vsel %vm5610_vm4, %v3037_v51, 0.0  ;;  %v5611_v52 = vmax.f32 %v3943_v29, %v3947_v31  ;;  %v3041_v57 = vpop.eup %3040  ;;  %v2291_v40 = vadd.f32 %v3035_v14, %v2123_v48  ;;  %5615 = vst [vmem:[#allocation83_spill] sm:$0xff] %v4496_v53  ;;  %5616 = vst [vmem:[#allocation84_spill] sm:$0xff] %v4498_v33 }
 0x272   : > { %v1956_v8 = vadd.f32 %v3039_v17, %v3037_v51  ;;  %vm5614_vm5 = vcmp.eq.s32.totalorder %v3830_v55, 1  ;;  %3060 = vpow2.f32 %v1747_v62  ;;  %v3043_v13 = vpop.eup %3042  ;;  %v4506_v56 = vsel %vm2152_vm3, %v4353_v11, %v3963_v35  ;;  %v4528_v55 = vpop.f32.mrb[50].mxu1 }
 0x273   : > { %v4488_v34 = vmax.f32 %v5611_v52, %v4353_v11  ;;  %v2004_v44 = vsel %vm5614_vm5, %v3039_v17, %v1836_v20  ;;  %3062 = vpow2.f32 %v1915_v50  ;;  %v4509_v51 = vmax.f32 %v1647_v2, %v4346_v63  ;;  %v3045_v48 = vpop.eup %3044  ;;  %v4534_v33 = vpop.f32.mrb[51].mxu1 }
 0x274   : > { %v2172_v52 = vsel %vm2148_vm15, %v3041_v57, %v2004_v44  ;;  %3064 = vrcp.f32 %v2291_v40  ;;  %v2124_v62 = vadd.f32 %v3041_v57, %v1956_v8  ;;  %v4518_v50 = vsel %vm2319_vm13, %v4346_v63, %v2199_v47  ;;  %v3047_v17 = vpop.eup %3046  ;;  %v4526_v57 = vpop.f32.mrb[50].mxu0 }
 0x275   : > { %v4513_v14 = vsel %vm2316_vm9, %v3043_v13, %v2172_v52  ;;  %3066 = vlog2.f32 %v2291_v40  ;;  %vm5617_vm10 = vcmp.eq.s32.totalorder %v3859_v0, 0  ;;  %v1719_v2 = vsub.f32 %v3933_v25, %v4509_v51  ;;  %5618 = vst [vmem:[#allocation85_spill] sm:$0xff] %v4526_v57  ;;  %v3049_v8 = vpop.eup %3048  ;;  %v4532_v40 = vpop.f32.mrb[51].mxu0 }
 0x276   : > { %v1837_v35 = vsel %vm5617_vm10, %v3045_v48, 0.0  ;;  %v1887_v20 = vsub.f32 %v3935_v26, %v4509_v51  ;;  %v2292_v44 = vadd.f32 %v3043_v13, %v2124_v62  ;;  %v1957_v52 = vadd.f32 %v3047_v17, %v3045_v48  ;;  %v3051_v53 = vpop.eup %3050 }
 0x277   : > { %vm5619_vm9 = vcmp.eq.s32.totalorder %v3859_v0, 1  ;;  %3068 = vpow2.f32 %v2083_v30  ;;  %v2409_v25 = vmul.f32 %v3049_v8, %v4420_v36  ;;  %v1749_v26 = vmul.f32 1.442695, %v1719_v2  ;;  %v3053_v57 = vpop.eup %3052  ;;  %v4543_v36 = vpop.f32.mrb[52].mxu0 }
 0x278   : > { %v2005_v47 = vsel %vm5619_vm9, %v3047_v17, %v1837_v35  ;;  %3070 = vpow2.f32 %v2251_v19  ;;  %v1917_v32 = vmul.f32 1.442695, %v1887_v20  ;;  %v2434_v7 = vmul.f32 0.6931472, %v3051_v53  ;;  %v3055_v30 = vpop.eup %3054  ;;  %v4545_v19 = vpop.f32.mrb[52].mxu1 }
 0x279   : > { %3072 = vrcp.f32 %v2292_v44  ;;  %v2055_v13 = vsub.f32 %v4344_v58, %v4509_v51  ;;  %v2223_v48 = vsub.f32 %v4346_v63, %v4509_v51  ;;  %v2529_v62 = vsub.f32 1.0, %v2409_v25  ;;  %5621 = vst [vmem:[#allocation86_spill] sm:$0xff] %v4545_v19  ;;  %v3057_v2 = vpop.eup %3056  ;;  %v4552_v20 = vpop.f32.mrb[53].mxu0 }
 0x27a   : > { %3074 = vlog2.f32 %v2292_v44  ;;  %v2125_v17 = vadd.f32 %v3053_v57, %v1957_v52  ;;  %vm5620_vm11 = vcmp.eq.s32.totalorder %v3859_v0, 2  ;;  %v2481_v53 = vadd.f32 %v2434_v7, %v4268_v28  ;;  %v4554_v8 = vpop.f32.mrb[53].mxu1  ;;  %v3059_v44 = vpop.eup %3058 }
 0x27b   : > { %v2173_v35 = vsel %vm5620_vm11, %v3053_v57, %v2005_v47  ;;  %3076 = vpow2.f32 %v1749_v26  ;;  %v2085_v63 = vmul.f32 1.442695, %v2055_v13  ;;  %v2553_v52 = vmul.f32 %v2529_v62, %v2529_v62 }
 0x27c   : > { %v4550_v58 = vsel %vm2317_vm7, %v3055_v30, %v2173_v35  ;;  %v2410_v57 = vmul.f32 %v3057_v2, %v4444_v46  ;;  %v2293_v47 = vadd.f32 %v3055_v30, %v2125_v17  ;;  %3078 = vpow2.f32 %v1917_v32  ;;  %v3061_v25 = vpop.eup %3060 }
 0x27d   : > { %v2505_v19 = vsub.f32 %v2481_v53, %v4266_v16  ;;  %v2436_v28 = vmul.f32 0.6931472, %v3059_v44  ;;  %3080 = vpow2.f32 %v2085_v63  ;;  %v2253_v0 = vmul.f32 1.442695, %v2223_v48  ;;  %v3063_v7 = vpop.eup %3062  ;;  %v4566_v16 = vpop.f32.mrb[54].mxu0 }
 0x27e   : > { %v2530_v35 = vsub.f32 1.0, %v2410_v57  ;;  %3082 = vrcp.f32 %v2293_v47  ;;  %vm5622_vm7 = vcmp.eq.s32.totalorder %v3866_v3, 0  ;;  %v4562_v13 = vmax.f32 %v4488_v34, %v4355_v1  ;;  %v3065_v62 = vpop.eup %3064  ;;  %v4571_v34 = vpop.f32.mrb[55].mxu0 }
 0x27f   : > { %v1838_v26 = vsel %vm5622_vm7, %v3061_v25, 0.0  ;;  %v2577_v46 = vmul.f32 %v2553_v52, %v2505_v19  ;;  %v2482_v32 = vadd.f32 %v2436_v28, %v4275_v61  ;;  %3084 = vlog2.f32 %v2293_v47  ;;  %v3067_v48 = vpop.eup %3066  ;;  %v4579_v57 = vpop.f32.mrb[54].mxu1 }
 0x280   : > { %v1958_v30 = vadd.f32 %v3063_v7, %v3061_v25  ;;  %vm2320_vm12 = vcmp.eq.s32.totalorder %v3902_v15, 3  ;;  %v2554_v17 = vmul.f32 %v2530_v35, %v2530_v35  ;;  %v2411_v2 = vmul.f32 %v3065_v62, %v4472_v60 }
 0x281   : > { %vm5623_vm14 = vcmp.eq.s32.totalorder %v3866_v3, 1  ;;  %3086 = vpow2.f32 %v2253_v0  ;;  %v3069_v63 = vpop.eup %3068  ;;  %v2506_v19 = vsub.f32 %v2482_v32, %v4272_v22  ;;  %v2438_v61 = vmul.f32 0.6931472, %v3067_v48 }
 0x282   : > { %v2006_v53 = vsel %vm5623_vm14, %v3063_v7, %v1838_v26  ;;  %v1720_v44 = vsub.f32 %v3943_v29, %v4562_v13  ;;  %v1888_v52 = vsub.f32 %v3947_v31, %v4562_v13  ;;  %vm2153_vm15 = vcmp.eq.s32.totalorder %v3931_v24, 2  ;;  %v3071_v60 = vpop.eup %3070 }
 0x283   : > { %v2531_v47 = vsub.f32 1.0, %v2411_v2  ;;  %v2126_v25 = vadd.f32 %v3069_v63, %v1958_v30  ;;  %v2174_v28 = vsel %vm2150_vm6, %v3069_v63, %v2006_v53  ;;  %v2056_v22 = vsub.f32 %v4353_v11, %v4562_v13  ;;  %v3073_v0 = vpop.eup %3072 }
 0x284   : > { %v2578_v7 = vmul.f32 %v2554_v17, %v2506_v19  ;;  %v2483_v29 = vadd.f32 %v2438_v61, %v4317_v4  ;;  %v4588_v31 = vsel %vm2318_vm8, %v3071_v60, %v2174_v28  ;;  %v1751_v35 = vmul.f32 1.442695, %v1720_v44  ;;  %v3075_v26 = vpop.eup %3074 }
 0x285   : > { %vm2154_vm0 = vcmp.eq.s32.totalorder %v3938_v27, 2  ;;  %v2555_v62 = vmul.f32 %v2531_v47, %v2531_v47  ;;  %v2412_v32 = vmul.f32 %v3073_v0, %v4513_v14  ;;  %v2294_v30 = vadd.f32 %v3071_v60, %v2126_v25  ;;  %v3077_v11 = vpop.eup %3076  ;;  %v4600_v60 = vpop.f32.mrb[55].mxu1 }
 0x286   : > { %v1919_v48 = vmul.f32 1.442695, %v1888_v52  ;;  %vm2321_vm6 = vcmp.eq.s32.totalorder %v3931_v24, 3  ;;  %vm2322_vm2 = vcmp.eq.s32.totalorder %v3938_v27, 3  ;;  %v2507_v4 = vsub.f32 %v2483_v29, %v4321_v9  ;;  %v3079_v2 = vpop.eup %3078 }
 0x287   : > { %v2440_v17 = vmul.f32 0.6931472, %v3075_v26  ;;  %3088 = vpow2.f32 %v1751_v35  ;;  %v2087_v3 = vmul.f32 1.442695, %v2056_v22  ;;  %v2532_v53 = vsub.f32 1.0, %v2412_v32  ;;  %v3081_v19 = vpop.eup %3080 }
 0x288   : > { %3090 = vrcp.f32 %v2294_v30  ;;  %vm5624_vm8 = vcmp.eq.s32.totalorder %v3895_v12, 0  ;;  %v2224_v14 = vsub.f32 %v4355_v1, %v4562_v13  ;;  %v2579_v61 = vmul.f32 %v2555_v62, %v2507_v4  ;;  %v3083_v9 = vpop.eup %3082 }
 0x289   : > { %v1839_v63 = vsel %vm5624_vm8, %v3077_v11, 0.0  ;;  %v2484_v44 = vadd.f32 %v2440_v17, %v4328_v54  ;;  %3092 = vlog2.f32 %v2294_v30  ;;  %v1959_v52 = vadd.f32 %v3079_v2, %v3077_v11  ;;  %v3085_v22 = vpop.eup %3084 }
 0x28a   : > { %v2556_v47 = vmul.f32 %v2532_v53, %v2532_v53  ;;  %vm5625_vm4 = vcmp.eq.s32.totalorder %v3895_v12, 1  ;;  %3094 = vpow2.f32 %v1919_v48  ;;  %v2255_v28 = vmul.f32 1.442695, %v2224_v14 }
 0x28b   : > { %v2007_v25 = vsel %vm5625_vm4, %v3079_v2, %v1839_v63  ;;  %v2601_v0 = vadd.f32 %v2579_v61, %v2577_v46  ;;  %v2508_v29 = vsub.f32 %v2484_v44, %v4333_v10  ;;  %v2413_v35 = vmul.f32 %v3083_v9, %v4550_v58  ;;  %v3087_v62 = vpop.eup %3086  ;;  %v5628_v2 = vld [vmem:[#allocation72_spill] sm:$0xff]  ;;  %v5629_v63 = vld [vmem:[#allocation15_spill] sm:$0xff] }
 0x28c   : > { %v2127_v26 = vadd.f32 %v3081_v19, %v1959_v52  ;;  %v2442_v54 = vmul.f32 0.6931472, %v3085_v22  ;;  %v2175_v32 = vsel %vm2151_vm1, %v3081_v19, %v2007_v25  ;;  %3096 = vpow2.f32 %v2087_v3  ;;  %v5630_v19 = vld [vmem:[#allocation70_spill] sm:$0xff]  ;;  %v5631_v44 = vld [vmem:[#allocation71_spill] sm:$0xff]  ;;  %v5633_v25 = vld [vmem:[#allocation17_spill] sm:$0xff] }
 0x28d   : > { %v4612_v30 = vsel %vm2320_vm12, %v4355_v1, %v4506_v56  ;;  %v2580_v48 = vmul.f32 %v2556_v47, %v2508_v29  ;;  %v2533_v11 = vsub.f32 1.0, %v2413_v35  ;;  %v2343_v10 = vsel %vm2319_vm13, %v3087_v62, %v2175_v32  ;;  %v5632_v47 = vld [vmem:[#allocation73_spill] sm:$0xff] }
 0x28e   : > { %v2295_v46 = vadd.f32 %v3087_v62, %v2127_v26  ;;  %v2485_v58 = vadd.f32 %v2442_v54, %v4380_v42  ;;  %3098 = vpow2.f32 %v2255_v28  ;;  %v5626_v4 = vmax.f32 %v3969_v37, %v3971_v38  ;;  %v5634_v28 = vld [vmem:[#allocation18_spill] sm:$0xff]  ;;  %v5636_v35 = vld [vmem:[#allocation13_spill] sm:$0xff] }
 0x28f   : > { %v2201_v1 = vsel %vm2153_vm15, %v4365_v39, %v3991_v45  ;;  %v4625_v56 = vadd.f32 %v2580_v48, %v2578_v7  ;;  %v2557_v3 = vmul.f32 %v2533_v11, %v2533_v11  ;;  %v5627_v12 = vmax.f32 %v3979_v41, %v3983_v43  ;;  %v5638_v11 = vld [vmem:[#allocation14_spill] sm:$0xff] }
 0x290   : > { %v1649_v17 = vmax.f32 %v5626_v4, %v4365_v39  ;;  %3100 = vrcp.f32 %v2295_v46  ;;  %v2509_v53 = vsub.f32 %v2485_v58, %v5628_v2  ;;  %v2202_v14 = vsel %vm2154_vm0, %v4383_v21, %v5629_v63 }
 0x291   : > { %v1650_v42 = vmax.f32 %v5627_v12, %v4383_v21  ;;  %3102 = vlog2.f32 %v2295_v46  ;;  %v3089_v45 = vpop.eup %3088  ;;  %v4642_v7 = vsel %vm2321_vm6, %v5630_v19, %v2201_v1  ;;  %v4650_v9 = vsel %vm2322_vm2, %v5631_v44, %v2202_v14 }
 0x292   : > { %v4637_v61 = vmax.f32 %v1649_v17, %v5630_v19  ;;  %v5635_v22 = vmax.f32 %v5633_v25, %v5634_v28  ;;  %vm2155_vm1 = vcmp.eq.s32.totalorder %v5636_v35, 2  ;;  %v3091_v26 = vpop.eup %3090  ;;  %v2581_v62 = vmul.f32 %v2557_v3, %v2509_v53 }
 0x293   : > { %v4645_v52 = vmax.f32 %v1650_v42, %v5631_v44  ;;  %vm5637_vm13 = vcmp.eq.s32.totalorder %v3902_v15, 0  ;;  %vm2156_vm5 = vcmp.eq.s32.totalorder %v5638_v11, 2  ;;  %v3093_v46 = vpop.eup %3092  ;;  %v2414_v58 = vmul.f32 %v3091_v26, %v4588_v31 }
 0x294   : > { %v1651_v29 = vmax.f32 %v5635_v22, %v5632_v47  ;;  %v1840_v54 = vsel %vm5637_vm13, %v3089_v45, 0.0  ;;  %v1721_v32 = vsub.f32 %v3969_v37, %v4637_v61  ;;  %v1889_v48 = vsub.f32 %v3971_v38, %v4637_v61  ;;  %v3095_v37 = vpop.eup %3094 }
 0x295   : > { %v2057_v4 = vsub.f32 %v4365_v39, %v4637_v61  ;;  %v2225_v17 = vsub.f32 %v5630_v19, %v4637_v61  ;;  %v1722_v1 = vsub.f32 %v3979_v41, %v4645_v52  ;;  %vm2323_vm10 = vcmp.eq.s32.totalorder %v5636_v35, 3 }
 0x296   : > { %v4672_v3 = vadd.f32 %v2601_v0, %v2581_v62  ;;  %v2444_v38 = vmul.f32 0.6931472, %v3093_v46  ;;  %v1753_v12 = vmul.f32 1.442695, %v1721_v32  ;;  %v1921_v42 = vmul.f32 1.442695, %v1889_v48  ;;  %v3097_v63 = vpop.eup %3096 }
 0x297   : > { %vm2324_vm9 = vcmp.eq.s32.totalorder %v5638_v11, 3  ;;  %v2534_v31 = vsub.f32 1.0, %v2414_v58  ;;  %v1960_v2 = vadd.f32 %v3095_v37, %v3089_v45  ;;  %vm5639_vm11 = vcmp.eq.s32.totalorder %v3902_v15, 1  ;;  %v5640_v15 = vld [vmem:[#allocation22_spill] sm:$0xff] }
 0x298   : > { %v2008_v39 = vsel %vm5639_vm11, %v3095_v37, %v1840_v54  ;;  %v2089_v53 = vmul.f32 1.442695, %v2057_v4  ;;  %v2486_v14 = vadd.f32 %v2444_v38, %v4403_v5  ;;  %3104 = vpow2.f32 %v1753_v12  ;;  %v3099_v62 = vpop.eup %3098 }
 0x299   : > { %v2257_v41 = vmul.f32 1.442695, %v2225_v17  ;;  %v1755_v19 = vmul.f32 1.442695, %v1722_v1  ;;  %v2558_v22 = vmul.f32 %v2534_v31, %v2534_v31  ;;  %v2128_v0 = vadd.f32 %v3097_v63, %v1960_v2  ;;  %v5642_v31 = vld [vmem:[#allocation21_spill] sm:$0xff] }
 0x29a   : > { %v2176_v26 = vsel %vm2152_vm3, %v3097_v63, %v2008_v39  ;;  %3106 = vpow2.f32 %v1921_v42  ;;  %v2510_v32 = vsub.f32 %v2486_v14, %v4456_v23  ;;  %v1890_v45 = vsub.f32 %v3983_v43, %v4645_v52  ;;  %v3101_v5 = vpop.eup %3100  ;;  %v5645_v14 = vld [vmem:[#allocation74_spill] sm:$0xff] }
 0x29b   : > { %3108 = vpow2.f32 %v2089_v53  ;;  %v2058_v54 = vsub.f32 %v4383_v21, %v4645_v52  ;;  %v2296_v48 = vadd.f32 %v3099_v62, %v2128_v0  ;;  %v4687_v46 = vsel %vm2320_vm12, %v3099_v62, %v2176_v26  ;;  %v3103_v4 = vpop.eup %3102  ;;  %v5644_v53 = vld [vmem:[#allocation23_spill] sm:$0xff] }
 0x29c   : > { %3110 = vpow2.f32 %v2257_v41  ;;  %v2226_v58 = vsub.f32 %v5631_v44, %v4645_v52  ;;  %v2582_v17 = vmul.f32 %v2558_v22, %v2510_v32  ;;  %v2415_v23 = vmul.f32 %v3101_v5, %v2343_v10  ;;  %v5641_v10 = vld [vmem:[#allocation20_spill] sm:$0xff]  ;;  %v5646_v22 = vld [vmem:[#allocation75_spill] sm:$0xff] }
 0x29d   : > { %3112 = vpow2.f32 %v1755_v19  ;;  %v1923_v1 = vmul.f32 1.442695, %v1890_v45  ;;  %v2446_v37 = vmul.f32 0.6931472, %v3103_v4  ;;  %v2091_v43 = vmul.f32 1.442695, %v2058_v54 }
 0x29e   : > { %3114 = vrcp.f32 %v2296_v48  ;;  %v2259_v38 = vmul.f32 1.442695, %v2226_v58  ;;  %v4692_v21 = vadd.f32 %v4625_v56, %v2582_v17  ;;  %v2535_v12 = vsub.f32 1.0, %v2415_v23  ;;  %v4732_v54 = vld [vmem:[#allocation7 + $0x60] sm:$0xff]  ;;  %v4741_v4 = vld [vmem:[#allocation7 + $0x68] sm:$0xff] }
 0x29f   : > { %3116 = vlog2.f32 %v2296_v48  ;;  %v2203_v42 = vsel %vm2155_vm1, %v5632_v47, %v5640_v15  ;;  %v2487_v44 = vadd.f32 %v2446_v37, %v4509_v51  ;;  %v5643_v2 = vmax.f32 %v5641_v10, %v5642_v31 }
 0x2a0   : > { %3118 = vpow2.f32 %v1923_v1  ;;  %v2204_v56 = vsel %vm2156_vm5, %v4412_v49, %v5644_v53  ;;  %v2559_v63 = vmul.f32 %v2535_v12, %v2535_v12  ;;  %v4708_v41 = vmax.f32 %v1651_v29, %v5645_v14 }
 0x2a1   : > { %v1652_v39 = vmax.f32 %v5643_v2, %v4412_v49  ;;  %3120 = vpow2.f32 %v2091_v43  ;;  %v4713_v51 = vsel %vm2323_vm10, %v5645_v14, %v2203_v42  ;;  %v2511_v19 = vsub.f32 %v2487_v44, %v4518_v50 }
 0x2a2   : > { %3122 = vpow2.f32 %v2259_v38  ;;  %v4722_v26 = vsel %vm2324_vm9, %v5646_v22, %v2204_v56  ;;  %v3105_v62 = vpop.eup %3104  ;;  %v1723_v29 = vsub.f32 %v5633_v25, %v4708_v41  ;;  %v1891_v32 = vsub.f32 %v5634_v28, %v4708_v41 }
 0x2a3   : > { %v4717_v0 = vmax.f32 %v1652_v39, %v5646_v22  ;;  %v2059_v45 = vsub.f32 %v5632_v47, %v4708_v41  ;;  %v2227_v50 = vsub.f32 %v5645_v14, %v4708_v41  ;;  %vm2157_vm3 = vcmp.eq.s32.totalorder %v4732_v54, 2 }
 0x2a4   : > { %v3107_v5 = vpop.eup %3106  ;;  %v2583_v48 = vmul.f32 %v2559_v63, %v2511_v19  ;;  %vm5647_vm7 = vcmp.eq.s32.totalorder %v3931_v24, 0  ;;  %vm2158_vm12 = vcmp.eq.s32.totalorder %v4741_v4, 2  ;;  %vm5648_vm14 = vcmp.eq.s32.totalorder %v3931_v24, 1 }
 0x2a5   : > { %v1841_v58 = vsel %vm5647_vm7, %v3105_v62, 0.0  ;;  %v1724_v25 = vsub.f32 %v5641_v10, %v4717_v0  ;;  %v1892_v28 = vsub.f32 %v5642_v31, %v4717_v0  ;;  %v3109_v47 = vpop.eup %3108  ;;  %v1961_v17 = vadd.f32 %v3107_v5, %v3105_v62 }
 0x2a6   : > { %v2009_v23 = vsel %vm5648_vm14, %v3107_v5, %v1841_v58  ;;  %v1757_v1 = vmul.f32 1.442695, %v1723_v29  ;;  %v1925_v37 = vmul.f32 1.442695, %v1891_v32  ;;  %vm2325_vm8 = vcmp.eq.s32.totalorder %v4732_v54, 3  ;;  %v3111_v43 = vpop.eup %3110  ;;  %v5652_v5 = vld [vmem:[#allocation26_spill] sm:$0xff] }
 0x2a7   : > { %v4748_v38 = vadd.f32 %v4672_v3, %v2583_v48  ;;  %v2177_v12 = vsel %vm2153_vm15, %v3109_v47, %v2009_v23  ;;  %v2093_v15 = vmul.f32 1.442695, %v2059_v45  ;;  %v2261_v42 = vmul.f32 1.442695, %v2227_v50  ;;  %v3113_v44 = vpop.eup %3112  ;;  %v5650_v45 = vld [vmem:[#allocation76_spill] sm:$0xff]  ;;  %v5651_v50 = vld [vmem:[#allocation25_spill] sm:$0xff] }
 0x2a8   : > { %v2129_v10 = vadd.f32 %v3109_v47, %v1961_v17  ;;  %v4754_v31 = vsel %vm2321_vm6, %v3111_v43, %v2177_v12  ;;  %3124 = vpow2.f32 %v1757_v1  ;;  %v1759_v2 = vmul.f32 1.442695, %v1724_v25  ;;  %v3115_v39 = vpop.eup %3114 }
 0x2a9   : > { %vm5649_vm4 = vcmp.eq.s32.totalorder %v3938_v27, 0  ;;  %3126 = vpow2.f32 %v1925_v37  ;;  %v1927_v3 = vmul.f32 1.442695, %v1892_v28  ;;  %v2060_v56 = vsub.f32 %v4412_v49, %v4717_v0  ;;  %v3117_v63 = vpop.eup %3116 }
 0x2aa   : > { %v1842_v53 = vsel %vm5649_vm4, %v3113_v44, 0.0  ;;  %v2416_v14 = vmul.f32 %v3115_v39, %v4687_v46  ;;  %v2297_v19 = vadd.f32 %v3111_v43, %v2129_v10  ;;  %3128 = vpow2.f32 %v2093_v15  ;;  %v3119_v62 = vpop.eup %3118  ;;  %v5655_v15 = vld [vmem:[#allocation30_spill] sm:$0xff] }
 0x2ab   : > { %v2228_v24 = vsub.f32 %v5646_v22, %v4717_v0  ;;  %v2448_v29 = vmul.f32 0.6931472, %v3117_v63  ;;  %3130 = vpow2.f32 %v2261_v42  ;;  %v2095_v32 = vmul.f32 1.442695, %v2060_v56  ;;  %v3121_v25 = vpop.eup %3120  ;;  %v5656_v42 = vld [vmem:[#allocation28_spill] sm:$0xff]  ;;  %v5659_v56 = vld [vmem:[#allocation31_spill] sm:$0xff] }
 0x2ac   : > { %v5653_v48 = vmax.f32 %v5651_v50, %v5652_v5  ;;  %v2536_v28 = vsub.f32 1.0, %v2416_v14  ;;  %3132 = vrcp.f32 %v2297_v19  ;;  %v1962_v49 = vadd.f32 %v3119_v62, %v3113_v44  ;;  %v3123_v47 = vpop.eup %3122  ;;  %v5657_v44 = vld [vmem:[#allocation29_spill] sm:$0xff] }
 0x2ad   : > { %vm5654_vm15 = vcmp.eq.s32.totalorder %v3938_v27, 1  ;;  %v2488_v17 = vadd.f32 %v2448_v29, %v4562_v13  ;;  %3134 = vlog2.f32 %v2297_v19  ;;  %v2263_v23 = vmul.f32 1.442695, %v2228_v24 }
 0x2ae   : > { %v1653_v58 = vmax.f32 %v5653_v48, %v5650_v45  ;;  %v2010_v46 = vsel %vm5654_vm15, %v3119_v62, %v1842_v53  ;;  %v2560_v1 = vmul.f32 %v2536_v28, %v2536_v28  ;;  %v2130_v37 = vadd.f32 %v3121_v25, %v1962_v49 }
 0x2af   : > { %v2178_v22 = vsel %vm2154_vm0, %v3121_v25, %v2010_v46  ;;  %3136 = vpow2.f32 %v1759_v2  ;;  %v2512_v12 = vsub.f32 %v2488_v17, %v4612_v30  ;;  %v2205_v13 = vsel %vm2157_vm3, %v5650_v45, %v5655_v15  ;;  %v5660_v30 = vld [vmem:[#allocation77_spill] sm:$0xff]  ;;  %v4818_v46 = vld [vmem:[#allocation7 + $0x70] sm:$0xff] }
 0x2b0   : > { %v4774_v43 = vsel %vm2322_vm2, %v3123_v47, %v2178_v22  ;;  %3138 = vpow2.f32 %v1927_v3  ;;  %v5658_v10 = vmax.f32 %v5656_v42, %v5657_v44  ;;  %v2298_v53 = vadd.f32 %v3123_v47, %v2130_v37 }
 0x2b1   : > { %3140 = vpow2.f32 %v2095_v32  ;;  %v4789_v27 = vsel %vm2158_vm12, %v4436_v59, %v5659_v56  ;;  %v4792_v2 = vmax.f32 %v1653_v58, %v5660_v30  ;;  %v2584_v3 = vmul.f32 %v2560_v1, %v2512_v12 }
 0x2b2   : > { %v1654_v39 = vmax.f32 %v5658_v10, %v4436_v59  ;;  %3142 = vpow2.f32 %v2263_v23  ;;  %v4797_v63 = vsel %vm2325_vm8, %v5660_v30, %v2205_v13  ;;  %v3125_v19 = vpop.eup %3124  ;;  %vm2326_vm0 = vcmp.eq.s32.totalorder %v4741_v4, 3  ;;  %v4831_v13 = vld [vmem:[#allocation7 + $0x78] sm:$0xff] }
 0x2b3   : > { %3144 = vrcp.f32 %v2298_v53  ;;  %v1725_v24 = vsub.f32 %v5651_v50, %v4792_v2  ;;  %v1893_v62 = vsub.f32 %v5652_v5, %v4792_v2  ;;  %v2061_v29 = vsub.f32 %v5650_v45, %v4792_v2  ;;  %v3127_v32 = vpop.eup %3126 }
 0x2b4   : > { %v4800_v14 = vmax.f32 %v1654_v39, %v4438_v6  ;;  %v4810_v48 = vadd.f32 %v4692_v21, %v2584_v3  ;;  %3146 = vlog2.f32 %v2298_v53  ;;  %vm5661_vm6 = vcmp.eq.s32.totalorder %v5636_v35, 0  ;;  %v3129_v50 = vpop.eup %3128 }
 0x2b5   : > { %v1843_v58 = vsel %vm5661_vm6, %v3125_v19, 0.0  ;;  %v2229_v25 = vsub.f32 %v5660_v30, %v4792_v2  ;;  %v1963_v28 = vadd.f32 %v3127_v32, %v3125_v19  ;;  %vm5662_vm2 = vcmp.eq.s32.totalorder %v5636_v35, 1  ;;  %v3131_v21 = vpop.eup %3130 }
 0x2b6   : > { %v2011_v5 = vsel %vm5662_vm2, %v3127_v32, %v1843_v58  ;;  %v1761_v49 = vmul.f32 1.442695, %v1725_v24  ;;  %v1929_v45 = vmul.f32 1.442695, %v1893_v62  ;;  %vm2159_vm13 = vcmp.eq.s32.totalorder %v4818_v46, 2  ;;  %v3133_v1 = vpop.eup %3132 }
 0x2b7   : > { %v2179_v47 = vsel %vm2155_vm1, %v3129_v50, %v2011_v5  ;;  %v2097_v17 = vmul.f32 1.442695, %v2061_v29  ;;  %v2265_v22 = vmul.f32 1.442695, %v2229_v25  ;;  %v1726_v23 = vsub.f32 %v5656_v42, %v4800_v14  ;;  %v3135_v10 = vpop.eup %3134 }
 0x2b8   : > { %v2131_v37 = vadd.f32 %v3129_v50, %v1963_v28  ;;  %v4827_v12 = vsel %vm2323_vm10, %v3131_v21, %v2179_v47  ;;  %3148 = vpow2.f32 %v1761_v49  ;;  %v1894_v15 = vsub.f32 %v5657_v44, %v4800_v14 }
 0x2b9   : > { %vm2160_vm11 = vcmp.eq.s32.totalorder %v4831_v13, 2  ;;  %v2417_v39 = vmul.f32 %v3133_v1, %v4754_v31  ;;  %3150 = vpow2.f32 %v1929_v45  ;;  %v1763_v53 = vmul.f32 1.442695, %v1726_v23  ;;  %v3137_v56 = vpop.eup %3136 }
 0x2ba   : > { %v2062_v42 = vsub.f32 %v4436_v59, %v4800_v14  ;;  %v2450_v35 = vmul.f32 0.6931472, %v3135_v10  ;;  %v2299_v30 = vadd.f32 %v3131_v21, %v2131_v37  ;;  %3152 = vpow2.f32 %v2097_v17  ;;  %v3139_v44 = vpop.eup %3138  ;;  %v5667_v10 = vld [vmem:[#allocation34_spill] sm:$0xff] }
 0x2bb   : > { %v1931_v3 = vmul.f32 1.442695, %v1894_v15  ;;  %vm2327_vm1 = vcmp.eq.s32.totalorder %v4818_v46, 3  ;;  %vm2328_vm10 = vcmp.eq.s32.totalorder %v4831_v13, 3  ;;  %v2537_v19 = vsub.f32 1.0, %v2417_v39  ;;  %v3141_v62 = vpop.eup %3140  ;;  %v5666_v15 = vld [vmem:[#allocation33_spill] sm:$0xff] }
 0x2bc   : > { %vm5663_vm7 = vcmp.eq.s32.totalorder %v5638_v11, 0  ;;  %3154 = vpow2.f32 %v2265_v22  ;;  %v2099_v31 = vmul.f32 1.442695, %v2062_v42  ;;  %v2489_v29 = vadd.f32 %v2450_v35, %v4637_v61  ;;  %v3143_v58 = vpop.eup %3142  ;;  %v5670_v35 = vld [vmem:[#allocation36_spill] sm:$0xff]  ;;  %v5702_v13 = vld [vmem:[#allocation50_spill] sm:$0xff] }
 0x2bd   : > { %v1844_v24 = vsel %vm5663_vm7, %v3137_v56, 0.0  ;;  %3156 = vrcp.f32 %v2299_v30  ;;  %v1964_v59 = vadd.f32 %v3139_v44, %v3137_v56  ;;  %vm5664_vm14 = vcmp.eq.s32.totalorder %v5638_v11, 1  ;;  %v3145_v5 = vpop.eup %3144  ;;  %v5665_v11 = vld [vmem:[#allocation78_spill] sm:$0xff] }
 0x2be   : > { %v2012_v32 = vsel %vm5664_vm14, %v3139_v44, %v1844_v24  ;;  %v2561_v25 = vmul.f32 %v2537_v19, %v2537_v19  ;;  %3158 = vlog2.f32 %v2299_v30  ;;  %v2230_v28 = vsub.f32 %v4438_v6, %v4800_v14  ;;  %v3147_v21 = vpop.eup %3146  ;;  %v5671_v30 = vld [vmem:[#allocation37_spill] sm:$0xff] }
 0x2bf   : > { %v2180_v50 = vsel %vm2156_vm5, %v3141_v62, %v2012_v32  ;;  %v2513_v49 = vsub.f32 %v2489_v29, %v4642_v7  ;;  %v2132_v45 = vadd.f32 %v3141_v62, %v1964_v59  ;;  %3160 = vpow2.f32 %v1763_v53  ;;  %v5675_v29 = vld [vmem:[#allocation39_spill] sm:$0xff] }
 0x2c0   : > { %v4851_v61 = vsel %vm2324_vm9, %v3143_v58, %v2180_v50  ;;  %v2418_v47 = vmul.f32 %v3145_v5, %v4774_v43  ;;  %3162 = vpow2.f32 %v1931_v3  ;;  %v2267_v17 = vmul.f32 1.442695, %v2230_v28  ;;  %v5669_v43 = vld [vmem:[#allocation38_spill] sm:$0xff] }
 0x2c1   : > { %v4858_v22 = vsel %vm2326_vm0, %v4438_v6, %v4789_v27  ;;  %v2585_v23 = vmul.f32 %v2561_v25, %v2513_v49  ;;  %v2452_v1 = vmul.f32 0.6931472, %v3147_v21  ;;  %v2300_v7 = vadd.f32 %v3143_v58, %v2132_v45  ;;  %v5677_v25 = vld [vmem:[#allocation79_spill] sm:$0xff]  ;;  %v5678_v45 = vld [vmem:[#allocation80_spill] sm:$0xff] }
 0x2c2   : > { %3164 = vpow2.f32 %v2099_v31  ;;  %v2538_v37 = vsub.f32 1.0, %v2418_v47  ;;  %v5668_v39 = vmax.f32 %v5666_v15, %v5667_v10  ;;  %v2207_v42 = vsel %vm2159_vm13, %v5665_v11, %v5669_v43  ;;  %v3149_v56 = vpop.eup %3148  ;;  %v5673_v31 = vld [vmem:[#allocation16_spill] sm:$0xff] }
 0x2c3   : > { %3166 = vpow2.f32 %v2267_v17  ;;  %v4869_v6 = vadd.f32 %v4748_v38, %v2585_v23  ;;  %v2490_v27 = vadd.f32 %v2452_v1, %v4645_v52  ;;  %v5672_v3 = vmax.f32 %v5670_v35, %v5671_v30  ;;  %v3151_v19 = vpop.eup %3150 }
 0x2c4   : > { %v1655_v53 = vmax.f32 %v5668_v39, %v5665_v11  ;;  %3168 = vrcp.f32 %v2300_v7  ;;  %v2562_v24 = vmul.f32 %v2538_v37, %v2538_v37  ;;  %vm5674_vm5 = vcmp.eq.s32.totalorder %v5673_v31, 0  ;;  %v3153_v59 = vpop.eup %3152 }
 0x2c5   : > { %v1656_v44 = vmax.f32 %v5672_v3, %v4464_v18  ;;  %3170 = vlog2.f32 %v2300_v7  ;;  %v1845_v62 = vsel %vm5674_vm5, %v3149_v56, 0.0  ;;  %v2208_v38 = vsel %vm2160_vm11, %v4464_v18, %v5675_v29 }
 0x2c6   : > { %v2514_v52 = vsub.f32 %v2490_v27, %v4650_v9  ;;  %v1965_v32 = vadd.f32 %v3151_v19, %v3149_v56  ;;  %vm5676_vm9 = vcmp.eq.s32.totalorder %v5673_v31, 1  ;;  %v4886_v50 = vmax.f32 %v1655_v53, %v5677_v25  ;;  %v3155_v28 = vpop.eup %3154  ;;  %v4916_v56 = vld [vmem:[#allocation7 + $0x80] sm:$0xff] }
 0x2c7   : > { %v2013_v58 = vsel %vm5676_vm9, %v3151_v19, %v1845_v62  ;;  %v4893_v49 = vsel %vm2327_vm1, %v5677_v25, %v2207_v42  ;;  %v4896_v21 = vmax.f32 %v1656_v44, %v5678_v45  ;;  %v4901_v9 = vsel %vm2328_vm10, %v5678_v45, %v2208_v38  ;;  %v3157_v47 = vpop.eup %3156  ;;  %v4922_v44 = vld [vmem:[#allocation7 + $0x88] sm:$0xff]  ;;  %v5679_v19 = vld [vmem:[#allocation19_spill] sm:$0xff] }
 0x2c8   : > { %v2181_v5 = vsel %vm2157_vm3, %v3153_v59, %v2013_v58  ;;  %v2586_v17 = vmul.f32 %v2562_v24, %v2514_v52  ;;  %v2133_v23 = vadd.f32 %v3153_v59, %v1965_v32  ;;  %v1727_v7 = vsub.f32 %v5666_v15, %v4886_v50  ;;  %v3159_v37 = vpop.eup %3158 }
 0x2c9   : > { %v4905_v1 = vsel %vm2325_vm8, %v3155_v28, %v2181_v5  ;;  %v2419_v39 = vmul.f32 %v3157_v47, %v4827_v12  ;;  %v1895_v53 = vsub.f32 %v5667_v10, %v4886_v50  ;;  %v2063_v43 = vsub.f32 %v5665_v11, %v4886_v50  ;;  %v3161_v54 = vpop.eup %3160 }
 0x2ca   : > { %v2231_v42 = vsub.f32 %v5677_v25, %v4886_v50  ;;  %vm2161_vm3 = vcmp.eq.s32.totalorder %v4916_v56, 2  ;;  %v4920_v27 = vadd.f32 %v4810_v48, %v2586_v17  ;;  %v2454_v15 = vmul.f32 0.6931472, %v3159_v37  ;;  %v3163_v10 = vpop.eup %3162 }
 0x2cb   : > { %v2301_v3 = vadd.f32 %v3155_v28, %v2133_v23  ;;  %v1765_v12 = vmul.f32 1.442695, %v1727_v7  ;;  %vm2162_vm8 = vcmp.eq.s32.totalorder %v4922_v44, 2  ;;  %v2539_v11 = vsub.f32 1.0, %v2419_v39 }
 0x2cc   : > { %vm5680_vm4 = vcmp.eq.s32.totalorder %v5679_v19, 0  ;;  %v1933_v31 = vmul.f32 1.442695, %v1895_v53  ;;  %v2101_v62 = vmul.f32 1.442695, %v2063_v43  ;;  %vm2329_vm15 = vcmp.eq.s32.totalorder %v4916_v56, 3  ;;  %v3165_v29 = vpop.eup %3164 }
 0x2cd   : > { %v1846_v24 = vsel %vm5680_vm4, %v3161_v54, 0.0  ;;  %v2491_v48 = vadd.f32 %v2454_v15, %v4708_v41  ;;  %3172 = vrcp.f32 %v2301_v3  ;;  %v1966_v38 = vadd.f32 %v3163_v10, %v3161_v54  ;;  %v3167_v52 = vpop.eup %3166 }
 0x2ce   : > { %vm5681_vm6 = vcmp.eq.s32.totalorder %v5679_v19, 1  ;;  %v2563_v32 = vmul.f32 %v2539_v11, %v2539_v11  ;;  %3174 = vlog2.f32 %v2301_v3  ;;  %v2269_v25 = vmul.f32 1.442695, %v2231_v42  ;;  %v3169_v28 = vpop.eup %3168  ;;  %v5682_v3 = vld [vmem:[#allocation81_spill] sm:$0xff] }
 0x2cf   : > { %v2014_v59 = vsel %vm5681_vm6, %v3163_v10, %v1846_v24  ;;  %v2515_v5 = vsub.f32 %v2491_v48, %v4713_v51  ;;  %v2134_v47 = vadd.f32 %v3165_v29, %v1966_v38  ;;  %3176 = vpow2.f32 %v1765_v12  ;;  %v3171_v41 = vpop.eup %3170  ;;  %v5683_v12 = vld [vmem:[#allocation41_spill] sm:$0xff]  ;;  %v5684_v10 = vld [vmem:[#allocation42_spill] sm:$0xff] }
 0x2d0   : > { %v2182_v58 = vsel %vm2158_vm12, %v3165_v29, %v2014_v59  ;;  %v2420_v23 = vmul.f32 %v3169_v28, %v4851_v61  ;;  %3178 = vpow2.f32 %v1933_v31  ;;  %v1728_v7 = vsub.f32 %v5670_v35, %v4896_v21  ;;  %v5686_v31 = vld [vmem:[#allocation46_spill] sm:$0xff]  ;;  %v5688_v29 = vld [vmem:[#allocation44_spill] sm:$0xff]  ;;  %v5689_v48 = vld [vmem:[#allocation45_spill] sm:$0xff] }
 0x2d1   : > { %v4936_v17 = vsel %vm2326_vm0, %v3167_v52, %v2182_v58  ;;  %v1896_v37 = vsub.f32 %v5671_v30, %v4896_v21  ;;  %v2587_v39 = vmul.f32 %v2563_v32, %v2515_v5  ;;  %v2456_v53 = vmul.f32 0.6931472, %v3171_v41  ;;  %v5691_v59 = vld [vmem:[#allocation47_spill] sm:$0xff]  ;;  %v5692_v58 = vld [vmem:[#allocation82_spill] sm:$0xff]  ;;  %v5693_v41 = vld [vmem:[#allocation84_spill] sm:$0xff] }
 0x2d2   : > { %v2302_v43 = vadd.f32 %v3167_v52, %v2134_v47  ;;  %3180 = vpow2.f32 %v2101_v62  ;;  %v2540_v51 = vsub.f32 1.0, %v2420_v23  ;;  %v1767_v4 = vmul.f32 1.442695, %v1728_v7  ;;  %v5687_v62 = vld [vmem:[#allocation83_spill] sm:$0xff] }
 0x2d3   : > { %3182 = vpow2.f32 %v2269_v25  ;;  %v1935_v42 = vmul.f32 1.442695, %v1896_v37  ;;  %v4944_v54 = vadd.f32 %v4869_v6, %v2587_v39  ;;  %v2492_v61 = vadd.f32 %v2456_v53, %v4717_v0 }
 0x2d4   : > { %3184 = vrcp.f32 %v2302_v43  ;;  %v2064_v35 = vsub.f32 %v4464_v18, %v4896_v21  ;;  %v2564_v15 = vmul.f32 %v2540_v51, %v2540_v51  ;;  %v2232_v30 = vsub.f32 %v5678_v45, %v4896_v21 }
 0x2d5   : > { %3186 = vlog2.f32 %v2302_v43  ;;  %v5685_v11 = vmax.f32 %v5683_v12, %v5684_v10  ;;  %v2516_v24 = vsub.f32 %v2492_v61, %v4722_v26  ;;  %v2209_v0 = vsel %vm2161_vm3, %v5682_v3, %v5686_v31 }
 0x2d6   : > { %3188 = vpow2.f32 %v1767_v4  ;;  %v2103_v6 = vmul.f32 1.442695, %v2064_v35  ;;  %v2271_v18 = vmul.f32 1.442695, %v2232_v30  ;;  %v5690_v45 = vmax.f32 %v5688_v29, %v5689_v48 }
 0x2d7   : > { %v1657_v19 = vmax.f32 %v5685_v11, %v5682_v3  ;;  %3190 = vpow2.f32 %v1935_v42  ;;  %v4968_v52 = vsel %vm2162_vm8, %v5687_v62, %v5691_v59  ;;  %v3173_v26 = vpop.eup %3172  ;;  %v2588_v32 = vmul.f32 %v2564_v15, %v2516_v24  ;;  %v5694_v42 = vld [vmem:[#allocation24_spill] sm:$0xff] }
 0x2d8   : > { %v1658_v38 = vmax.f32 %v5690_v45, %v5687_v62  ;;  %3192 = vpow2.f32 %v2103_v6  ;;  %v4976_v28 = vsel %vm2329_vm15, %v5692_v58, %v2209_v0  ;;  %v3175_v5 = vpop.eup %3174  ;;  %v2421_v47 = vmul.f32 %v3173_v26, %v4905_v1 }
 0x2d9   : > { %v4971_v25 = vmax.f32 %v1657_v19, %v5692_v58  ;;  %3194 = vpow2.f32 %v2271_v18  ;;  %v3177_v7 = vpop.eup %3176  ;;  %v4983_v37 = vadd.f32 %v4920_v27, %v2588_v32  ;;  %v2458_v39 = vmul.f32 0.6931472, %v3175_v5 }
 0x2da   : > { %v4980_v23 = vmax.f32 %v1658_v38, %v5693_v41  ;;  %v3179_v51 = vpop.eup %3178  ;;  %v2541_v4 = vsub.f32 1.0, %v2421_v47  ;;  %vm5695_vm12 = vcmp.eq.s32.totalorder %v5694_v42, 0  ;;  %vm2330_vm0 = vcmp.eq.s32.totalorder %v4922_v44, 3  ;;  %v5718_v44 = vld [vmem:[#allocation62_spill] sm:$0xff] }
 0x2db   : > { %v1729_v53 = vsub.f32 %v5683_v12, %v4971_v25  ;;  %v1897_v43 = vsub.f32 %v5684_v10, %v4971_v25  ;;  %v1847_v1 = vsel %vm5695_vm12, %v3177_v7, 0.0  ;;  %v2065_v61 = vsub.f32 %v5682_v3, %v4971_v25 }
 0x2dc   : > { %v2233_v35 = vsub.f32 %v5692_v58, %v4971_v25  ;;  %v3181_v27 = vpop.eup %3180  ;;  %v2493_v15 = vadd.f32 %v2458_v39, %v4792_v2  ;;  %v1967_v30 = vadd.f32 %v3179_v51, %v3177_v7  ;;  %vm5696_vm2 = vcmp.eq.s32.totalorder %v5694_v42, 1  ;;  %v5697_v39 = vld [vmem:[#allocation27_spill] sm:$0xff] }
 0x2dd   : > { %v2015_v12 = vsel %vm5696_vm2, %v3179_v51, %v1847_v1  ;;  %v1769_v10 = vmul.f32 1.442695, %v1729_v53  ;;  %v3183_v11 = vpop.eup %3182  ;;  %v2565_v19 = vmul.f32 %v2541_v4, %v2541_v4  ;;  %v1937_v6 = vmul.f32 1.442695, %v1897_v43 }
 0x2de   : > { %v2183_v24 = vsel %vm2159_vm13, %v3181_v27, %v2015_v12  ;;  %v2105_v3 = vmul.f32 1.442695, %v2065_v61  ;;  %v3185_v31 = vpop.eup %3184  ;;  %v2517_v0 = vsub.f32 %v2493_v15, %v4797_v63  ;;  %v2135_v18 = vadd.f32 %v3181_v27, %v1967_v30 }
 0x2df   : > { %v5004_v45 = vsel %vm2327_vm1, %v3183_v11, %v2183_v24  ;;  %3196 = vpow2.f32 %v1769_v10  ;;  %v3187_v2 = vpop.eup %3186  ;;  %v2422_v38 = vmul.f32 %v3185_v31, %v4936_v17  ;;  %v2273_v59 = vmul.f32 1.442695, %v2233_v35 }
 0x2e0   : > { %3198 = vpow2.f32 %v1937_v6  ;;  %v1730_v26 = vsub.f32 %v5688_v29, %v4980_v23  ;;  %v3189_v32 = vpop.eup %3188  ;;  %v2589_v58 = vmul.f32 %v2565_v19, %v2517_v0  ;;  %v2460_v5 = vmul.f32 0.6931472, %v3187_v2  ;;  %v5701_v19 = vld [vmem:[#allocation49_spill] sm:$0xff]  ;;  %v5704_v2 = vld [vmem:[#allocation54_spill] sm:$0xff] }
 0x2e1   : > { %v2303_v47 = vadd.f32 %v3183_v11, %v2135_v18  ;;  %3200 = vpow2.f32 %v2105_v3  ;;  %v3191_v63 = vpop.eup %3190  ;;  %v2542_v7 = vsub.f32 1.0, %v2422_v38  ;;  %vm5698_vm13 = vcmp.eq.s32.totalorder %v5697_v39, 0  ;;  %v5700_v11 = vld [vmem:[#allocation85_spill] sm:$0xff] }
 0x2e2   : > { %v1848_v46 = vsel %vm5698_vm13, %v3189_v32, 0.0  ;;  %3202 = vpow2.f32 %v2273_v59  ;;  %v1771_v53 = vmul.f32 1.442695, %v1730_v26  ;;  %v3193_v43 = vpop.eup %3192  ;;  %v5012_v17 = vadd.f32 %v4944_v54, %v2589_v58  ;;  %v5706_v38 = vld [vmem:[#allocation53_spill] sm:$0xff]  ;;  %v5708_v58 = vld [vmem:[#allocation32_spill] sm:$0xff] }
 0x2e3   : > { %v2494_v51 = vadd.f32 %v2460_v5, %v4800_v14  ;;  %3204 = vrcp.f32 %v2303_v47  ;;  %v1968_v29 = vadd.f32 %v3191_v63, %v3189_v32  ;;  %v3195_v4 = vpop.eup %3194  ;;  %v2566_v42 = vmul.f32 %v2542_v7, %v2542_v7 }
 0x2e4   : > { %3206 = vlog2.f32 %v2303_v47  ;;  %vm5699_vm1 = vcmp.eq.s32.totalorder %v5697_v39, 1  ;;  %v1898_v61 = vsub.f32 %v5689_v48, %v4980_v23  ;;  %v2066_v30 = vsub.f32 %v5687_v62, %v4980_v23  ;;  %v5040_v62 = vld [vmem:[#allocation7 + $0x90] sm:$0xff]  ;;  %v5056_v47 = vld [vmem:[#allocation7 + $0x98] sm:$0xff] }
 0x2e5   : > { %v2016_v1 = vsel %vm5699_vm1, %v3191_v63, %v1848_v46  ;;  %v2518_v35 = vsub.f32 %v2494_v51, %v4858_v22  ;;  %v2136_v27 = vadd.f32 %v3193_v43, %v1968_v29  ;;  %3208 = vpow2.f32 %v1771_v53  ;;  %v5711_v46 = vld [vmem:[#allocation55_spill] sm:$0xff] }
 0x2e6   : > { %v2184_v54 = vsel %vm2160_vm11, %v3193_v43, %v2016_v1  ;;  %v1939_v15 = vmul.f32 1.442695, %v1898_v61  ;;  %v2234_v12 = vsub.f32 %v5693_v41, %v4980_v23  ;;  %v5034_v22 = vsel %vm2330_vm0, %v5693_v41, %v4968_v52  ;;  %v5705_v41 = vld [vmem:[#allocation52_spill] sm:$0xff] }
 0x2e7   : > { %v5024_v14 = vsel %vm2328_vm10, %v3195_v4, %v2184_v54  ;;  %v2590_v10 = vmul.f32 %v2566_v42, %v2518_v35  ;;  %v2304_v48 = vadd.f32 %v3195_v4, %v2136_v27  ;;  %v5703_v24 = vmax.f32 %v5701_v19, %v5702_v13 }
 0x2e8   : > { %3210 = vpow2.f32 %v1939_v15  ;;  %v2107_v3 = vmul.f32 1.442695, %v2066_v30  ;;  %v2275_v31 = vmul.f32 1.442695, %v2234_v12  ;;  %vm2163_vm11 = vcmp.eq.s32.totalorder %v5040_v62, 2 }
 0x2e9   : > { %v1659_v6 = vmax.f32 %v5703_v24, %v5700_v11  ;;  %v3197_v0 = vpop.eup %3196  ;;  %v5044_v18 = vadd.f32 %v4983_v37, %v2590_v10  ;;  %3212 = vrcp.f32 %v2304_v48  ;;  %v2211_v52 = vsel %vm2163_vm11, %v5700_v11, %v5704_v2 }
 0x2ea   : > { %v5707_v59 = vmax.f32 %v5705_v41, %v5706_v38  ;;  %v3199_v32 = vpop.eup %3198  ;;  %3214 = vlog2.f32 %v2304_v48  ;;  %vm5709_vm10 = vcmp.eq.s32.totalorder %v5708_v58, 0  ;;  %vm2164_vm7 = vcmp.eq.s32.totalorder %v5056_v47, 2 }
 0x2eb   : > { %v1849_v5 = vsel %vm5709_vm10, %v3197_v0, 0.0  ;;  %v5060_v37 = vmax.f32 %v1659_v6, %v4528_v55  ;;  %v3201_v63 = vpop.eup %3200  ;;  %v1969_v7 = vadd.f32 %v3199_v32, %v3197_v0  ;;  %vm5710_vm14 = vcmp.eq.s32.totalorder %v5708_v58, 1  ;;  %v5712_v6 = vld [vmem:[#allocation35_spill] sm:$0xff] }
 0x2ec   : > { %v1660_v26 = vmax.f32 %v5707_v59, %v4532_v40  ;;  %v2017_v39 = vsel %vm5710_vm14, %v3199_v32, %v1849_v5  ;;  %3216 = vpow2.f32 %v2107_v3  ;;  %v2212_v53 = vsel %vm2164_vm7, %v4532_v40, %v5711_v46  ;;  %v3203_v43 = vpop.eup %3202  ;;  %v5714_v32 = vld [vmem:[#allocation57_spill] sm:$0xff] }
 0x2ed   : > { %v2185_v51 = vsel %vm2161_vm3, %v3201_v63, %v2017_v39  ;;  %3218 = vpow2.f32 %v2275_v31  ;;  %v1731_v29 = vsub.f32 %v5701_v19, %v5060_v37  ;;  %v1899_v4 = vsub.f32 %v5702_v13, %v5060_v37  ;;  %v3205_v42 = vpop.eup %3204 }
 0x2ee   : > { %v2137_v1 = vadd.f32 %v3201_v63, %v1969_v7  ;;  %v5076_v61 = vsel %vm2329_vm15, %v3203_v43, %v2185_v51  ;;  %v2067_v35 = vsub.f32 %v5700_v11, %v5060_v37  ;;  %v2235_v27 = vsub.f32 %v4528_v55, %v5060_v37  ;;  %v3207_v54 = vpop.eup %3206 }
 0x2ef   : > { %v2423_v15 = vmul.f32 %v3205_v42, %v5004_v45  ;;  %v1773_v30 = vmul.f32 1.442695, %v1731_v29  ;;  %v1941_v12 = vmul.f32 1.442695, %v1899_v4  ;;  %vm2331_vm5 = vcmp.eq.s32.totalorder %v5040_v62, 3  ;;  %v3209_v10 = vpop.eup %3208 }
 0x2f0   : > { %v2462_v48 = vmul.f32 0.6931472, %v3207_v54  ;;  %v2305_v19 = vadd.f32 %v3203_v43, %v2137_v1  ;;  %v2109_v13 = vmul.f32 1.442695, %v2067_v35  ;;  %v2277_v56 = vmul.f32 1.442695, %v2235_v27 }
 0x2f1   : > { %v2543_v24 = vsub.f32 1.0, %v2423_v15  ;;  %vm5713_vm9 = vcmp.eq.s32.totalorder %v5712_v6, 0  ;;  %3220 = vpow2.f32 %v1773_v30  ;;  %v5089_v11 = vsel %vm2331_vm5, %v4528_v55, %v2211_v52  ;;  %v5715_v55 = vld [vmem:[#allocation58_spill] sm:$0xff] }
 0x2f2   : > { %v1850_v3 = vsel %vm5713_vm9, %v3209_v10, 0.0  ;;  %v2495_v45 = vadd.f32 %v2462_v48, %v4886_v50  ;;  %3222 = vrcp.f32 %v2305_v19  ;;  %v5093_v31 = vmax.f32 %v1660_v26, %v4534_v33  ;;  %v3211_v0 = vpop.eup %3210  ;;  %v5128_v48 = vld [vmem:[#allocation7 + $0xa0] sm:$0xff] }
 0x2f3   : > { %vm2332_vm3 = vcmp.eq.s32.totalorder %v5056_v47, 3  ;;  %v2567_v2 = vmul.f32 %v2543_v24, %v2543_v24  ;;  %3224 = vlog2.f32 %v2305_v19  ;;  %v5716_v52 = vmax.f32 %v5714_v32, %v5715_v55  ;;  %v3213_v50 = vpop.eup %3212  ;;  %v5719_v19 = vld [vmem:[#allocation60_spill] sm:$0xff]  ;;  %v5139_v24 = vld [vmem:[#allocation7 + $0xa8] sm:$0xff] }
 0x2f4   : > { %v5099_v59 = vsel %vm2332_vm3, %v4534_v33, %v2212_v53  ;;  %v2519_v5 = vsub.f32 %v2495_v45, %v4893_v49  ;;  %v1970_v26 = vadd.f32 %v3211_v0, %v3209_v10  ;;  %vm5717_vm4 = vcmp.eq.s32.totalorder %v5712_v6, 1  ;;  %v3215_v7 = vpop.eup %3214 }
 0x2f5   : > { %v1661_v58 = vmax.f32 %v5716_v52, %v4543_v36  ;;  %v2018_v63 = vsel %vm5717_vm4, %v3211_v0, %v1850_v3  ;;  %3226 = vpow2.f32 %v1941_v12  ;;  %v2424_v39 = vmul.f32 %v3213_v50, %v5024_v14  ;;  %v5722_v3 = vld [vmem:[#allocation40_spill] sm:$0xff]  ;;  %v5724_v50 = vld [vmem:[#allocation63_spill] sm:$0xff] }
 0x2f6   : > { %3228 = vpow2.f32 %v2109_v13  ;;  %v1732_v46 = vsub.f32 %v5705_v41, %v5093_v31  ;;  %v1900_v53 = vsub.f32 %v5706_v38, %v5093_v31  ;;  %v3217_v43 = vpop.eup %3216  ;;  %v2591_v51 = vmul.f32 %v2567_v2, %v2519_v5  ;;  %v5720_v13 = vld [vmem:[#allocation61_spill] sm:$0xff] }
 0x2f7   : > { %v2464_v29 = vmul.f32 0.6931472, %v3215_v7  ;;  %3230 = vpow2.f32 %v2277_v56  ;;  %v2068_v49 = vsub.f32 %v4532_v40, %v5093_v31  ;;  %v3219_v4 = vpop.eup %3218  ;;  %v2544_v42 = vsub.f32 1.0, %v2424_v39 }
 0x2f8   : > { %v2138_v1 = vadd.f32 %v3217_v43, %v1970_v26  ;;  %v2186_v14 = vsel %vm2162_vm8, %v3217_v43, %v2018_v63  ;;  %v1775_v35 = vmul.f32 1.442695, %v1732_v46  ;;  %v5118_v27 = vadd.f32 %v5012_v17, %v2591_v51  ;;  %v5725_v26 = vld [vmem:[#allocation86_spill] sm:$0xff] }
 0x2f9   : > { %v2496_v41 = vadd.f32 %v2464_v29, %v4896_v21  ;;  %v5123_v38 = vsel %vm2330_vm0, %v3219_v4, %v2186_v14  ;;  %v1943_v54 = vmul.f32 1.442695, %v1900_v53  ;;  %v2568_v15 = vmul.f32 %v2544_v42, %v2544_v42 }
 0x2fa   : > { %v2306_v30 = vadd.f32 %v3219_v4, %v2138_v1  ;;  %3232 = vpow2.f32 %v1775_v35  ;;  %v2111_v40 = vmul.f32 1.442695, %v2068_v49  ;;  %v2236_v10 = vsub.f32 %v4534_v33, %v5093_v31 }
 0x2fb   : > { %v2520_v12 = vsub.f32 %v2496_v41, %v4901_v9  ;;  %3234 = vpow2.f32 %v1943_v54  ;;  %vm2165_vm8 = vcmp.eq.s32.totalorder %v5128_v48, 2  ;;  %v3221_v21 = vpop.eup %3220  ;;  %v5721_v56 = vmax.f32 %v5719_v19, %v5720_v13 }
 0x2fc   : > { %3236 = vrcp.f32 %v2306_v30  ;;  %v2213_v17 = vsel %vm2165_vm8, %v4543_v36, %v5718_v44  ;;  %vm2166_vm15 = vcmp.eq.s32.totalorder %v5139_v24, 2  ;;  %v3223_v33 = vpop.eup %3222  ;;  %vm5723_vm6 = vcmp.eq.s32.totalorder %v5722_v3, 0 }
 0x2fd   : > { %v1662_v9 = vmax.f32 %v5721_v56, %v4552_v20  ;;  %v2592_v6 = vmul.f32 %v2568_v15, %v2520_v12  ;;  %3238 = vlog2.f32 %v2306_v30  ;;  %v1851_v45 = vsel %vm5723_vm6, %v3221_v21, 0.0  ;;  %v3225_v2 = vpop.eup %3224 }
 0x2fe   : > { %v2279_v0 = vmul.f32 1.442695, %v2236_v10  ;;  %v2425_v52 = vmul.f32 %v3223_v33, %v5076_v61  ;;  %3240 = vpow2.f32 %v2111_v40  ;;  %v5149_v5 = vsel %vm2166_vm15, %v4552_v20, %v5724_v50  ;;  %v5727_v10 = vld [vmem:[#allocation43_spill] sm:$0xff] }
 0x2ff   : > { %v5152_v63 = vmax.f32 %v1661_v58, %v5725_v26  ;;  %v3227_v7 = vpop.eup %3226  ;;  %v5155_v39 = vadd.f32 %v5044_v18, %v2592_v6  ;;  %v2466_v46 = vmul.f32 0.6931472, %v3225_v2  ;;  %vm2333_vm12 = vcmp.eq.s32.totalorder %v5128_v48, 3 }
 0x300   : > { %3242 = vpow2.f32 %v2279_v0  ;;  %v3229_v53 = vpop.eup %3228  ;;  %v2545_v61 = vsub.f32 1.0, %v2425_v52  ;;  %v1971_v43 = vadd.f32 %v3227_v7, %v3221_v21  ;;  %vm5726_vm0 = vcmp.eq.s32.totalorder %v5722_v3, 1 }
 0x301   : > { %v2019_v51 = vsel %vm5726_vm0, %v3227_v7, %v1851_v45  ;;  %v1733_v29 = vsub.f32 %v5714_v32, %v5152_v63  ;;  %v3231_v49 = vpop.eup %3230  ;;  %v2497_v58 = vadd.f32 %v2466_v46, %v4971_v25  ;;  %v1901_v4 = vsub.f32 %v5715_v55, %v5152_v63 }
 0x302   : > { %v2187_v18 = vsel %vm2163_vm11, %v3229_v53, %v2019_v51  ;;  %v2069_v42 = vsub.f32 %v4543_v36, %v5152_v63  ;;  %v2569_v1 = vmul.f32 %v2545_v61, %v2545_v61  ;;  %v2139_v14 = vadd.f32 %v3229_v53, %v1971_v43 }
 0x303   : > { %v5171_v35 = vsel %vm2331_vm5, %v3231_v49, %v2187_v18  ;;  %v1777_v41 = vmul.f32 1.442695, %v1733_v29  ;;  %v2521_v32 = vsub.f32 %v2497_v58, %v4976_v28  ;;  %v1945_v54 = vmul.f32 1.442695, %v1901_v4  ;;  %v5730_v29 = vld [vmem:[#allocation64_spill] sm:$0xff]  ;;  %v5219_v4 = vld [vmem:[#allocation7 + $0xb0] sm:$0xff] }
 0x304   : > { %v2113_v25 = vmul.f32 1.442695, %v2069_v42  ;;  %v2237_v15 = vsub.f32 %v5725_v26, %v5152_v63  ;;  %v3233_v30 = vpop.eup %3232  ;;  %v2307_v40 = vadd.f32 %v3231_v49, %v2139_v14  ;;  %v5179_v36 = vsel %vm2333_vm12, %v5725_v26, %v2213_v17 }
 0x305   : > { %3244 = vpow2.f32 %v1777_v41  ;;  %v5182_v62 = vmax.f32 %v1662_v9, %v4554_v8  ;;  %v3235_v55 = vpop.eup %3234  ;;  %v2593_v12 = vmul.f32 %v2569_v1, %v2521_v32  ;;  %vm5728_vm2 = vcmp.eq.s32.totalorder %v5727_v10, 0  ;;  %v5733_v1 = vld [vmem:[#allocation68_spill] sm:$0xff]  ;;  %v5734_v41 = vld [vmem:[#allocation66_spill] sm:$0xff]  ;;  %v5735_v32 = vld [vmem:[#allocation67_spill] sm:$0xff] }
 0x306   : > { %v1852_v28 = vsel %vm5728_vm2, %v3233_v30, 0.0  ;;  %3246 = vpow2.f32 %v1945_v54  ;;  %v2281_v21 = vmul.f32 1.442695, %v2237_v15  ;;  %v3237_v44 = vpop.eup %3236  ;;  %v1972_v56 = vadd.f32 %v3235_v55, %v3233_v30  ;;  %v5232_v30 = vld [vmem:[#allocation7 + $0xb8] sm:$0xff] }
 0x307   : > { %3248 = vrcp.f32 %v2307_v40  ;;  %vm5729_vm13 = vcmp.eq.s32.totalorder %v5727_v10, 1  ;;  %v1734_v17 = vsub.f32 %v5719_v19, %v5182_v62  ;;  %v3239_v6 = vpop.eup %3238  ;;  %v5191_v9 = vadd.f32 %v5118_v27, %v2593_v12 }
 0x308   : > { %v2020_v33 = vsel %vm5729_vm13, %v3235_v55, %v1852_v28  ;;  %v2426_v3 = vmul.f32 %v3237_v44, %v5123_v38  ;;  %3250 = vlog2.f32 %v2307_v40  ;;  %v1902_v45 = vsub.f32 %v5720_v13, %v5182_v62  ;;  %v3241_v0 = vpop.eup %3240 }
 0x309   : > { %v2468_v2 = vmul.f32 0.6931472, %v3239_v6  ;;  %3252 = vpow2.f32 %v2113_v25  ;;  %v1779_v52 = vmul.f32 1.442695, %v1734_v17  ;;  %v2070_v50 = vsub.f32 %v4552_v20, %v5182_v62 }
 0x30a   : > { %v3243_v26 = vpop.eup %3242  ;;  %v2546_v7 = vsub.f32 1.0, %v2426_v3  ;;  %v2140_v19 = vadd.f32 %v3241_v0, %v1972_v56  ;;  %v2188_v27 = vsel %vm2164_vm7, %v3241_v0, %v2020_v33  ;;  %3254 = vpow2.f32 %v2281_v21  ;;  %v5740_v56 = vld [vmem:[#allocation69_spill] sm:$0xff] }
 0x30b   : > { %v2498_v38 = vadd.f32 %v2468_v2, %v4980_v23  ;;  %v5203_v46 = vsel %vm2332_vm3, %v3243_v26, %v2188_v27  ;;  %3256 = vpow2.f32 %v1779_v52  ;;  %v1947_v13 = vmul.f32 1.442695, %v1902_v45  ;;  %v5731_v23 = vld [vmem:[#allocation65_spill] sm:$0xff] }
 0x30c   : > { %v2570_v53 = vmul.f32 %v2546_v7, %v2546_v7  ;;  %v2308_v61 = vadd.f32 %v3243_v26, %v2140_v19  ;;  %v2115_v43 = vmul.f32 1.442695, %v2070_v50  ;;  %v2238_v20 = vsub.f32 %v4554_v8, %v5182_v62 }
 0x30d   : > { %v2522_v51 = vsub.f32 %v2498_v38, %v5034_v22  ;;  %3258 = vpow2.f32 %v1947_v13  ;;  %vm2334_vm1 = vcmp.eq.s32.totalorder %v5139_v24, 3  ;;  %v5732_v49 = vmax.f32 %v5730_v29, %v5731_v23 }
 0x30e   : > { %3260 = vrcp.f32 %v2308_v61  ;;  %v2283_v58 = vmul.f32 1.442695, %v2238_v20  ;;  %v5217_v18 = vsel %vm2334_vm1, %v4554_v8, %v5149_v5  ;;  %vm2167_vm11 = vcmp.eq.s32.totalorder %v5219_v4, 2  ;;  %v5737_v8 = vld [vmem:[#allocation48_spill] sm:$0xff] }
 0x30f   : > { %v1663_v47 = vmax.f32 %v5732_v49, %v4566_v16  ;;  %v3245_v22 = vpop.eup %3244  ;;  %v2594_v42 = vmul.f32 %v2570_v53, %v2522_v51  ;;  %3262 = vlog2.f32 %v2308_v61  ;;  %v2215_v14 = vsel %vm2167_vm11, %v4566_v16, %v5733_v1  ;;  %v5741_v61 = vld [vmem:[#allocation51_spill] sm:$0xff] }
 0x310   : > { %v5736_v54 = vmax.f32 %v5734_v41, %v5735_v32  ;;  %v3247_v15 = vpop.eup %3246  ;;  %vm5738_vm10 = vcmp.eq.s32.totalorder %v5737_v8, 0  ;;  %3264 = vpow2.f32 %v2115_v43  ;;  %vm2168_vm7 = vcmp.eq.s32.totalorder %v5232_v30, 2 }
 0x311   : > { %v1853_v5 = vsel %vm5738_vm10, %v3245_v22, 0.0  ;;  %v5236_v40 = vmax.f32 %v1663_v47, %v4579_v57  ;;  %v3249_v55 = vpop.eup %3248  ;;  %v5239_v12 = vadd.f32 %v5155_v39, %v2594_v42  ;;  %v1973_v10 = vadd.f32 %v3247_v15, %v3245_v22 }
 0x312   : > { %v1664_v25 = vmax.f32 %v5736_v54, %v4571_v34  ;;  %vm5739_vm14 = vcmp.eq.s32.totalorder %v5737_v8, 1  ;;  %3266 = vpow2.f32 %v2283_v58  ;;  %v3251_v21 = vpop.eup %3250  ;;  %v2427_v44 = vmul.f32 %v3249_v55, %v5171_v35 }
 0x313   : > { %v2021_v28 = vsel %vm5739_vm14, %v3247_v15, %v1853_v5  ;;  %v2216_v33 = vsel %vm2168_vm7, %v4571_v34, %v5740_v56  ;;  %v1735_v17 = vsub.f32 %v5730_v29, %v5236_v40  ;;  %v1903_v39 = vsub.f32 %v5731_v23, %v5236_v40  ;;  %v3253_v6 = vpop.eup %3252 }
 0x314   : > { %v2470_v3 = vmul.f32 0.6931472, %v3251_v21  ;;  %v2071_v45 = vsub.f32 %v4566_v16, %v5236_v40  ;;  %v2239_v0 = vsub.f32 %v4579_v57, %v5236_v40  ;;  %vm2335_vm5 = vcmp.eq.s32.totalorder %v5219_v4, 3  ;;  %v3255_v35 = vpop.eup %3254 }
 0x315   : > { %v2547_v2 = vsub.f32 1.0, %v2427_v44  ;;  %v2141_v52 = vadd.f32 %v3253_v6, %v1973_v10  ;;  %v2189_v50 = vsel %vm2165_vm8, %v3253_v6, %v2021_v28  ;;  %v1781_v26 = vmul.f32 1.442695, %v1735_v17  ;;  %v3257_v7 = vpop.eup %3256 }
 0x316   : > { %v2499_v19 = vadd.f32 %v2470_v3, %v5060_v37  ;;  %v2357_v27 = vsel %vm2333_vm12, %v3255_v35, %v2189_v50  ;;  %v1949_v38 = vmul.f32 1.442695, %v1903_v39  ;;  %v2117_v16 = vmul.f32 1.442695, %v2071_v45  ;;  %v5744_v3 = vld [vmem:[#allocation56_spill] sm:$0xff] }
 0x317   : > { %v2571_v13 = vmul.f32 %v2547_v2, %v2547_v2  ;;  %v2309_v53 = vadd.f32 %v3255_v35, %v2141_v52  ;;  %vm5742_vm9 = vcmp.eq.s32.totalorder %v5741_v61, 0  ;;  %3268 = vpow2.f32 %v1781_v26  ;;  %v3259_v20 = vpop.eup %3258 }
 0x318   : > { %v1854_v43 = vsel %vm5742_vm9, %v3257_v7, 0.0  ;;  %v2523_v51 = vsub.f32 %v2499_v19, %v5089_v11  ;;  %3270 = vpow2.f32 %v1949_v38  ;;  %v2285_v29 = vmul.f32 1.442695, %v2239_v0  ;;  %v3261_v48 = vpop.eup %3260 }
 0x319   : > { %v5268_v37 = vsel %vm2335_vm5, %v4579_v57, %v2215_v14  ;;  %3272 = vrcp.f32 %v2309_v53  ;;  %v1974_v23 = vadd.f32 %v3259_v20, %v3257_v7  ;;  %vm5743_vm3 = vcmp.eq.s32.totalorder %v5741_v61, 1  ;;  %v3263_v58 = vpop.eup %3262 }
 0x31a   : > { %v2022_v49 = vsel %vm5743_vm3, %v3259_v20, %v1854_v43  ;;  %v5273_v47 = vmax.f32 %v1664_v25, %v4600_v60  ;;  %v2595_v22 = vmul.f32 %v2571_v13, %v2523_v51  ;;  %v2428_v11 = vmul.f32 %v3261_v48, %v5203_v46  ;;  %v3265_v42 = vpop.eup %3264  ;;  %v5747_v43 = vld [vmem:[#allocation59_spill] sm:$0xff] }
 0x31b   : > { %3274 = vlog2.f32 %v2309_v53  ;;  %vm2336_vm4 = vcmp.eq.s32.totalorder %v5232_v30, 3  ;;  %v2472_v1 = vmul.f32 0.6931472, %v3263_v58  ;;  %v2142_v8 = vadd.f32 %v3265_v42, %v1974_v23 }
 0x31c   : > { %3276 = vpow2.f32 %v2117_v16  ;;  %v1736_v57 = vsub.f32 %v5734_v41, %v5273_v47  ;;  %v1904_v14 = vsub.f32 %v5735_v32, %v5273_v47  ;;  %v3267_v54 = vpop.eup %3266  ;;  %v2609_v25 = vadd.f32 %v5191_v9, %v2595_v22 }
 0x31d   : > { %v2548_v15 = vsub.f32 1.0, %v2428_v11  ;;  %v2190_v46 = vsel %vm2166_vm15, %v3265_v42, %v2022_v49  ;;  %v2500_v5 = vadd.f32 %v2472_v1, %v5093_v31  ;;  %3278 = vpow2.f32 %v2285_v29 }
 0x31e   : > { %v2358_v55 = vsel %vm2334_vm1, %v3267_v54, %v2190_v46  ;;  %v1783_v10 = vmul.f32 1.442695, %v1736_v57  ;;  %v2310_v41 = vadd.f32 %v3267_v54, %v2142_v8  ;;  %v1951_v21 = vmul.f32 1.442695, %v1904_v14 }
 0x31f   : > { %v2572_v28 = vmul.f32 %v2548_v15, %v2548_v15  ;;  %v2072_v32 = vsub.f32 %v4571_v34, %v5273_v47  ;;  %v2524_v9 = vsub.f32 %v2500_v5, %v5099_v59  ;;  %v2240_v44 = vsub.f32 %v4600_v60, %v5273_v47 }
 0x320   : > { %3280 = vpow2.f32 %v1783_v10  ;;  %v5295_v31 = vsel %vm2336_vm4, %v4600_v60, %v2216_v33  ;;  %vm5745_vm8 = vcmp.eq.s32.totalorder %v5744_v3, 0  ;;  %vm5746_vm15 = vcmp.eq.s32.totalorder %v5744_v3, 1 }
 0x321   : > { %3282 = vrcp.f32 %v2310_v41  ;;  %v2119_v24 = vmul.f32 1.442695, %v2072_v32  ;;  %v3269_v56 = vpop.eup %3268  ;;  %v2596_v17 = vmul.f32 %v2572_v28, %v2524_v9  ;;  %v2287_v39 = vmul.f32 1.442695, %v2240_v44 }
 0x322   : > { %3284 = vlog2.f32 %v2310_v41  ;;  %v3271_v6 = vpop.eup %3270  ;;  %v1855_v34 = vsel %vm5745_vm8, %v3269_v56, 0.0  ;;  %vm5748_vm6 = vcmp.eq.s32.totalorder %v5747_v43, 0  ;;  %vm5749_vm12 = vcmp.eq.s32.totalorder %v5747_v43, 1 }
 0x323   : > { %3286 = vpow2.f32 %v1951_v21  ;;  %v3273_v59 = vpop.eup %3272  ;;  %v2626_v45 = vadd.f32 %v5239_v12, %v2596_v17  ;;  %v1975_v0 = vadd.f32 %v3271_v6, %v3269_v56  ;;  %v2023_v35 = vsel %vm5746_vm15, %v3271_v6, %v1855_v34 }
 0x324   : > { %3288 = vpow2.f32 %v2119_v24  ;;  %v2429_v33 = vmul.f32 %v3273_v59, %v2357_v27 }
 0x325   : > { %v3275_v60 = vpop.eup %3274  ;;  %3290 = vpow2.f32 %v2287_v39 }
 0x326   : > { %v3277_v2 = vpop.eup %3276  ;;  %v2474_v52 = vmul.f32 0.6931472, %v3275_v60  ;;  %v2549_v50 = vsub.f32 1.0, %v2429_v33  ;;  %v3464_v33 = vmov 1966171168  }
 0x327   : > { %v2143_v26 = vadd.f32 %v3277_v2, %v1975_v0  ;;  %v2191_v7 = vsel %vm2167_vm11, %v3277_v2, %v2023_v35  ;;  %v3279_v19 = vpop.eup %3278  ;;  %v2639_v2 = vunpack.c.l.s4 %v3464_v33 }
 0x328   : > { %v2501_v38 = vadd.f32 %v2474_v52, %v5152_v63  ;;  %v2573_v16 = vmul.f32 %v2549_v50, %v2549_v50  ;;  %v2359_v13 = vsel %vm2335_vm5, %v3279_v19, %v2191_v7  ;;  %v2641_v52 = vlaneseq }
 0x329   : > { %v2311_v12 = vadd.f32 %v3279_v19, %v2143_v26  ;;  %v2640_v19 = vunpack.c.0.s8 %v2639_v2 }
 0x32a   : > { %v3281_v53 = vpop.eup %3280  ;;  %v2525_v61 = vsub.f32 %v2501_v38, %v5179_v36  ;;  %vm2655_vm0 = vcmp.lt.s32.totalorder %v2641_v52, 256 }
 0x32b   : > { %v3283_v27 = vpop.eup %3282  ;;  %3292 = vrcp.f32 %v2311_v12  ;;  %v1856_v20 = vsel %vm5748_vm6, %v3281_v53, 0.0 }
 0x32c   : > { %v3285_v51 = vpop.eup %3284  ;;  %v2597_v29 = vmul.f32 %v2573_v16, %v2525_v61  ;;  %v2430_v48 = vmul.f32 %v3283_v27, %v2358_v55  ;;  %3294 = vlog2.f32 %v2311_v12 }
 0x32d   : > { %v3287_v23 = vpop.eup %3286  ;;  %v2476_v49 = vmul.f32 0.6931472, %v3285_v51 }
 0x32e   : > { %v3289_v63 = vpop.eup %3288  ;;  %v2610_v58 = vadd.f32 %v2609_v25, %v2597_v29  ;;  %v2550_v22 = vsub.f32 1.0, %v2430_v48  ;;  %v1976_v11 = vadd.f32 %v3287_v23, %v3281_v53  ;;  %v2024_v4 = vsel %vm5749_vm12, %v3287_v23, %v1856_v20 }
 0x32f   : > { %v3291_v42 = vpop.eup %3290  ;;  %v2502_v36 = vadd.f32 %v2476_v49, %v5182_v62  ;;  %v2192_v1 = vsel %vm2168_vm7, %v3289_v63, %v2024_v4 }
 0x330   : > { %v2574_v57 = vmul.f32 %v2550_v22, %v2550_v22  ;;  %v2144_v14 = vadd.f32 %v3289_v63, %v1976_v11  ;;  %v2360_v54 = vsel %vm2336_vm4, %v3291_v42, %v2192_v1 }
 0x331   : > { %v2526_v15 = vsub.f32 %v2502_v36, %v5217_v18 }
 0x332   : > { %v2312_v8 = vadd.f32 %v3291_v42, %v2144_v14 }
 0x333   : > { %v2598_v25 = vmul.f32 %v2574_v57, %v2526_v15 }
 0x334   : > { %3296 = vrcp.f32 %v2312_v8 }
 0x335   : > { %v3293_v46 = vpop.eup %3292  ;;  %v2627_v5 = vadd.f32 %v2626_v45, %v2598_v25  ;;  %3298 = vlog2.f32 %v2312_v8 }
 0x336   : > { %v3295_v55 = vpop.eup %3294  ;;  %v2431_v10 = vmul.f32 %v3293_v46, %v2359_v13 }
 0x337   : > { %v2478_v28 = vmul.f32 0.6931472, %v3295_v55 }
 0x338   : > { %v2551_v62 = vsub.f32 1.0, %v2431_v10 }
 0x339   : > { %v2503_v41 = vadd.f32 %v2478_v28, %v5236_v40 }
 0x33a   : > { %v2575_v21 = vmul.f32 %v2551_v62, %v2551_v62 }
 0x33b   : > { %v2527_v32 = vsub.f32 %v2503_v41, %v5268_v37 }
 0x33d   : > { %v2599_v9 = vmul.f32 %v2575_v21, %v2527_v32 }
 0x33e   : > { %v3297_v30 = vpop.eup %3296 }
 0x33f   : > { %v3299_v44 = vpop.eup %3298  ;;  %v2611_v24 = vadd.f32 %v2610_v58, %v2599_v9  ;;  %v2432_v18 = vmul.f32 %v3297_v30, %v2360_v54 }
 0x340   : > { %v2480_v56 = vmul.f32 0.6931472, %v3299_v44 }
 0x341   : > { %v2612_v17 = vrot.slane %v2611_v24, 4  ;;  %v2552_v39 = vsub.f32 1.0, %v2432_v18 }
 0x342   : > { %v2504_v6 = vadd.f32 %v2480_v56, %v5273_v47  ;;  %v2642_v47 = vshrl.u32 %v2641_v52, 7 }
 0x343   : > { %v2613_v3 = vadd.f32 %v2612_v17, %v2611_v24  ;;  %v2576_v34 = vmul.f32 %v2552_v39, %v2552_v39 }
 0x344   : > { %v2528_v59 = vsub.f32 %v2504_v6, %v5295_v31  ;;  %v2643_v12 = vsub.s32 %v2640_v19, %v2642_v47 }
 0x345   : > { %v2614_v45 = vrot.slane %v2613_v3, 2 }
 0x346   : > { %v2600_v40 = vmul.f32 %v2576_v34, %v2528_v59 }
 0x347   : > { %v2615_v35 = vadd.f32 %v2614_v45, %v2613_v3 }
 0x348   : > { %v2628_v0 = vadd.f32 %v2627_v5, %v2600_v40 }
 0x349   : > { %v2616_v50 = vrot.slane %v2615_v35, 1 }
 0x34a   : > { %v2629_v37 = vrot.slane %v2628_v0, 4 }
 0x34b   : > { %v2617_v38 = vadd.f32 %v2616_v50, %v2615_v35 }
 0x34c   : > { %v2630_v60 = vadd.f32 %v2629_v37, %v2628_v0 }
 0x34e   : > { %v2631_v26 = vrot.slane %v2630_v60, 2 }
 0x350   : > { %v2632_v7 = vadd.f32 %v2631_v26, %v2630_v60 }
 0x352   : > { %v2633_v16 = vrot.slane %v2632_v7, 1 }
 0x354   : > { %v2634_v31 = vadd.f32 %v2633_v16, %v2632_v7 }
 0x356   : > { %v2637_v13 = vcombine.low %v2617_v38, %v2634_v31 }
 0x358   : > { %v2644_v53 = vrot.slane %v2637_v13, %v2643_v12 }
 0x35a   : > { %v2651_v61 = vrot.slane %v2644_v53, %v2643_v12 }
 0x35c   : > { %2657 = vst.msk [vmem:[%s243_s29] sm:$0x3] %vm2655_vm0, %v2651_v61 }
 0x35d   : > { %3381 = shalt.err (!%p3378_p6)
}
 0x35e   : > { %s3382_s22 = scalar_lea.hbm %s5327_s11, 32  ;;  %s3386_s26 = scalar_lea.hbm %s5378_s4, 64 }
 0x35f   : > { %p3383_p7 = scmp.ne.s32.totalorder %s5327_s11, %s3382_s22  ;;  %p3387_p0 = scmp.lt.u32.totalorder %s5327_s11, %s5378_s4 }
 0x360   : > { %p3388_p1 = scmp.lt.u32.totalorder %s3386_s26, %s3382_s22  ;;  %p3390_p4 = scmp.lt.u32.totalorder %s3382_s22, %s5327_s11 }
 0x361   : > { %p3384_p9 = pnand %p3383_p7, %p5750_p8 }
 0x362   : > { %p3389_p13 = por %p3388_p1, %p3387_p0 }
 0x363   : > { %p3385_p12 = pneg %p3384_p9 }
 0x364   : > { %p3391_p10 = por %p3390_p4, %p3389_p13 }
 0x366   : > { %p3392_p11 = pnand %p3391_p10, %p3385_p12 }
 0x368   : > { %3395 = shalt.err (!%p3392_p11)
}
 0x369   : > { %2913 = dma.vmem_to_hbm [thread:$0]  (%p5750_p8), %s5329_s30, 32, %s5327_s11, %s2659_s12  }
 0x36a PF: > { %p2930_p2 = scmp.ge.s32.totalorder %s3454_s20, 2  ;;  %s2687_s10 = sand.u32 1, %s3434_s15  }
 0x36b   : > { %p5751_p3 = scmp.ne.s32.totalorder %s5528_s27, 0  ;;  %s2688_s29 = scalar_lea.sflag [#allocation6], %s2687_s10 }
 0x36d   : > { %p2923_p5 = pnand %p2930_p2, %p5751_p3 }
 0x36f   : > { %3429 = dma.done.wait (!%p2923_p5), %s2688_s29, 32  }
 0x370   : > { %3431 = vsyncadd (!%p2923_p5), %s2688_s29, 4294967264  ;;  %s19_s20 = sadd.s32 1, %s3454_s20   ;;  %s5752_s15 = smov %s3438_s16 }
 0x371   : > { %p16_p6 = scmp.ge.s32.totalorder %s19_s20, 4   ;;  %s5753_s16 = smov %s3442_s17 }
 0x372   : > { %s5754_s17 = smov %s3544_s28  ;;  %s5755_s18 = smov %s3450_s19 }
 0x373   : > { %s5756_s19 = smov %s5758_s23  ;;  %18 = sbr.rel (!%p16_p6) target bundleno = 6 (0x6), region = 89 }
 0x37a   :  { %2693 = vsyncpa [#allocation5], 1 }
 0x37b   :  { %2695 = vsyncpa [#allocation5 + $0x1], 1 }
 0x37c   :  { %2696 = vsyncpa [#allocation8], 1 }
 0x37d   :  { %2697 = vsyncpa [#allocation6], 1 }
 0x37e   :  { %2699 = vsyncpa [#allocation6 + $0x1], 1 }

</bundles_post_ra>
